<compile_context>
chip_gen: v6e
topology: v6e:2x2x1
jax: 0.10.0
libtpu: 0.0.40
codegen_flags: <defaults>
</compile_context>

<pallas_src>
import jax
import jax.numpy as jnp
from jax.experimental import pallas as pl
from jax.experimental.pallas import tpu as pltpu


def _round_up(x, m):
    return ((x + m - 1) // m) * m


# ---------------------------------------------------------------------------
# Fused Pallas kernel: 3x conv3x3 + 3x train-mode BN+ReLU + stride-2 downsample
# ---------------------------------------------------------------------------
def _make_downsample_kernel(N, H, W, c_in_p, c_out_p):
    M = H * W
    Mo = (H // 2) * (W // 2)
    NM = N * M
    f32 = jnp.float32

    def kernel(x_ref, w1_ref, w2_ref, w3_ref, bn_ref, sel_ref, mask_ref,
               out_ref, out2_ref, p_ref):

        def conv3x3(act, cin, w):
            """act: (cin, N*M) channel-major flat-spatial slab, cin % 8 == 0.

            Builds the im2col RHS
              P[t*cin + c, n*M + h*W + w] = act[c, n*M + (h+kh-1)*W + (w+kw-1)]
            (zero outside each image) with one whole-slab lane roll, one 0/1
            edge-mask multiply and one 8-sublane-aligned store per tap, then
            does ONE MXU matmul.  No conv bias: the following training-mode
            BatchNorm cancels a per-channel constant exactly.
            """
            for kh in range(3):
                for kw in range(3):
                    t = kh * 3 + kw
                    s = (kh - 1) * W + (kw - 1)          # flat-lane tap shift
                    a = act if s == 0 else pltpu.roll(act, shift=(-s) % NM, axis=1)
                    m = mask_ref[t]                      # (c_rep, N*M), 0/1
                    if m.shape[0] != cin:
                        m = m[:cin]
                    p_ref[t * cin:(t + 1) * cin, :] = a * m
            return jnp.dot(w, p_ref[0:9 * cin, :], preferred_element_type=f32)

        def bn_relu(y, gamma_col, beta_col):
            # Training-mode BatchNorm2d (biased batch variance, eps=1e-5),
            # fused with ReLU.  Per-channel stats over all N*spatial columns.
            inv_cnt = 1.0 / y.shape[1]
            mean = jnp.sum(y, axis=1, keepdims=True) * inv_cnt
            d = y - mean
            var = jnp.sum(d * d, axis=1, keepdims=True) * inv_cnt
            return jnp.maximum(
                d * jax.lax.rsqrt(var + 1e-5) * gamma_col + beta_col, 0.0)

        bnp = bn_ref[...]                                # (c_out_p, 6)

        # ---- Conv_BN_ReLU_2 --------------------------------------------------
        y1 = conv3x3(x_ref[...], c_in_p, w1_ref[...])
        a1 = bn_relu(y1, bnp[:, 0:1], bnp[:, 1:2])       # (c_out_p, N*M)
        y2 = conv3x3(a1, c_out_p, w2_ref[...])
        out_cm = bn_relu(y2, bnp[:, 2:3], bnp[:, 3:4])   # (c_out_p, N*M)

        # lane-dense stores, already in (N, C, H*W) == flattened NCHW order
        for n in range(N):
            out_ref[n] = out_cm[:, n * M:(n + 1) * M]

        # ---- downsample: stride-2 conv -> BN -> ReLU -------------------------
        # stride-2/pad-1/k=3 conv == stride-1 conv evaluated at even (h, w);
        # the even-position gather is a small per-batch (M, Mo) selection matmul.
        y3 = conv3x3(out_cm, c_out_p, w3_ref[...])       # (c_out_p, N*M)
        sel = sel_ref[...]                               # (M, Mo)
        for n in range(N):
            out2_ref[:, n * Mo:(n + 1) * Mo] = jnp.dot(
                y3[:, n * M:(n + 1) * M], sel, preferred_element_type=f32)
        # BN3 + ReLU on the assembled (c_out_p, N*Mo) slab; final store is a
        # single full-lane write (128 lanes here).
        out2_ref[...] = bn_relu(out2_ref[...], bnp[:, 4:5], bnp[:, 5:6])

    return kernel


# ---------------------------------------------------------------------------
# Plain-JAX glue: mConv2d weight generation, constant helper arrays
# ---------------------------------------------------------------------------
def _linear_init(key, in_f, out_f):
    kw, kb = jax.random.split(key)
    bound = 1.0 / (in_f ** 0.5)
    w = jax.random.uniform(kw, (out_f, in_f), jnp.float32, -bound, bound)
    b = jax.random.uniform(kb, (out_f,), jnp.float32, -bound, bound)
    return w, b


def _linear(x, wb):
    w, b = wb
    return x @ w.T + b


def make_mconv_params(key, length, in_ch, out_ch):
    k1, k2, k3, k4 = jax.random.split(key, 4)
    return dict(
        lin1=_linear_init(k1, length, length),
        lin2=_linear_init(k2, length, 9 * in_ch * out_ch),
        blin1=_linear_init(k3, length, length),   # bias generator: only used by the
        blin2=_linear_init(k4, length, out_ch),   # reference (train-mode BN cancels it)
    )


def _mconv_weights_packed(p, array, c_in, c_out, c_in_p, c_out_p):
    """Channel-major conv weight (c_out_p, 9*c_in_p); column (kh*3+kw)*c_in_p + c.

    Padded output rows / input columns are zero.  Conv bias is intentionally not
    generated for the kernel path: training-mode BN cancels it exactly."""
    h = jax.nn.leaky_relu(_linear(array, p["lin1"]), 0.01)
    k = _linear(h, p["lin2"]).reshape(c_out, c_in, 3, 3)      # PyTorch OIHW
    w = jnp.transpose(k, (0, 2, 3, 1))                        # (c_out, 3, 3, c_in)
    w = jnp.pad(w, ((0, c_out_p - c_out), (0, 0), (0, 0), (0, c_in_p - c_in)))
    return w.reshape(c_out_p, 9 * c_in_p)


def _pad_ch(v, c_p, fill):
    if v.shape[0] == c_p:
        return v
    return jnp.concatenate([v, jnp.full((c_p - v.shape[0],), fill, v.dtype)])


def _make_subsample_matrix(H, W):
    """S[h*W + w, h2*Wo + w2] = 1 iff h = 2*h2 and w = 2*w2 (per-batch block)."""
    Ho, Wo = H // 2, W // 2
    M, Mo = H * W, Ho * Wo
    h2 = jnp.arange(Ho)[:, None]
    w2 = jnp.arange(Wo)[None, :]
    rows = (2 * h2 * W + 2 * w2).reshape(-1)
    cols = (h2 * Wo + w2).reshape(-1)
    return jnp.zeros((M, Mo), jnp.float32).at[rows, cols].set(1.0)


def _make_edge_masks(N, H, W, c_rep):
    """(9, c_rep, N*M) 0/1 masks: 1 iff tap (kh, kw) at output (h, w) reads inside
    its own image.  Implements the zero padding in-kernel AND zeroes every lane
    that the whole-slab roll would fill with cross-batch / wrap data."""
    h = jnp.arange(H)[:, None]
    w = jnp.arange(W)[None, :]
    rows = []
    for kh in range(3):
        for kw in range(3):
            dh, dw = kh - 1, kw - 1
            ok = ((h + dh >= 0) & (h + dh < H) & (w + dw >= 0) & (w + dw < W))
            rows.append(ok.reshape(-1))
    m = jnp.stack(rows, axis=0).astype(jnp.float32)           # (9, M)
    m = jnp.tile(m, (1, N))                                    # (9, N*M)
    return jnp.tile(m[:, None, :], (1, c_rep, 1))              # (9, c_rep, N*M)


# ---------------------------------------------------------------------------
# DownsampleLayer forward (single fused pallas_call)
# ---------------------------------------------------------------------------
def downsample_layer_forward(params, array, x_nchw):
    """x_nchw: (N, C_in, H, W). Returns (out, out_2) in NCHW:
    (N, C_out, H, W) and (N, C_out, H//2, W//2)."""
    N, c_in, H, W = x_nchw.shape
    M, Mo = H * W, (H // 2) * (W // 2)
    c_out = params["bn1_g"].shape[0]
    c_in_p, c_out_p = _round_up(c_in, 8), _round_up(c_out, 8)
    c_rep = max(c_in_p, c_out_p)

    # mConv2d kernel generation (tiny MLPs on `array`) -- plain-JAX glue.
    w1 = _mconv_weights_packed(params["conv1"], array, c_in, c_out, c_in_p, c_out_p)
    w2 = _mconv_weights_packed(params["conv2"], array, c_out, c_out, c_out_p, c_out_p)
    w3 = _mconv_weights_packed(params["conv3"], array, c_out, c_out, c_out_p, c_out_p)

    bn = jnp.stack([
        _pad_ch(params["bn1_g"], c_out_p, 1.0), _pad_ch(params["bn1_b"], c_out_p, 0.0),
        _pad_ch(params["bn2_g"], c_out_p, 1.0), _pad_ch(params["bn2_b"], c_out_p, 0.0),
        _pad_ch(params["bn3_g"], c_out_p, 1.0), _pad_ch(params["bn3_b"], c_out_p, 0.0),
    ], axis=1)                                                 # (c_out_p, 6)

    sel = _make_subsample_matrix(H, W)                         # (M, Mo)
    mask = _make_edge_masks(N, H, W, c_rep)                    # (9, c_rep, N*M)

    # Channel-major, lane-dense input slab (tiny one-off XLA pad + transpose).
    x_pad = jnp.pad(x_nchw, ((0, 0), (0, c_in_p - c_in), (0, 0), (0, 0)))
    x_cm = jnp.transpose(x_pad, (1, 0, 2, 3)).reshape(c_in_p, N * M)

    vmem = pl.BlockSpec(memory_space=pltpu.MemorySpace.VMEM)
    out_flat, out2_flat = pl.pallas_call(
        _make_downsample_kernel(N, H, W, c_in_p, c_out_p),
        out_shape=(jax.ShapeDtypeStruct((N, c_out_p, M), jnp.float32),
                   jax.ShapeDtypeStruct((c_out_p, N * Mo), jnp.float32)),
        in_specs=[vmem] * 7,
        out_specs=(vmem, vmem),
        scratch_shapes=[pltpu.VMEM((9 * c_rep, N * M), jnp.float32)],
        compiler_params=pltpu.CompilerParams(vmem_limit_bytes=32 * 1024 * 1024),
    )(x_cm, w1, w2, w3, bn, sel, mask)

    out = out_flat[:, :c_out].reshape(N, c_out, H, W)
    out2 = (out2_flat.reshape(c_out_p, N, Mo).transpose(1, 0, 2)[:, :c_out]
            .reshape(N, c_out, H // 2, W // 2))
    return out, out2


# ---------------------------------------------------------------------------
# Pure-JAX reference that follows the PyTorch module exactly (incl. conv bias)
# ---------------------------------------------------------------------------
def _reference_forward(params, array, x):
    def gen_kernel_bias(p, c_in, c_out):
        h = jax.nn.leaky_relu(_linear(array, p["lin1"]), 0.01)
        k = _linear(h, p["lin2"]).reshape(c_out, c_in, 3, 3)
        hb = jax.nn.leaky_relu(_linear(array, p["blin1"]), 0.01)
        b = _linear(hb, p["blin2"])
        return k, b

    def conv(x, p, c_in, c_out, stride):
        k, b = gen_kernel_bias(p, c_in, c_out)
        y = jax.lax.conv_general_dilated(
            x, k, (stride, stride), ((1, 1), (1, 1)),
            dimension_numbers=("NCHW", "OIHW", "NCHW"))
        return y + b[None, :, None, None]

    def bn_relu(y, g, b):
        mean = y.mean(axis=(0, 2, 3), keepdims=True)
        var = ((y - mean) ** 2).mean(axis=(0, 2, 3), keepdims=True)
        yn = (y - mean) * jax.lax.rsqrt(var + 1e-5)
        return jnp.maximum(yn * g[None, :, None, None] + b[None, :, None, None], 0.0)

    c_in = x.shape[1]
    c_out = params["bn1_g"].shape[0]
    a1 = bn_relu(conv(x, params["conv1"], c_in, c_out, 1), params["bn1_g"], params["bn1_b"])
    out = bn_relu(conv(a1, params["conv2"], c_out, c_out, 1), params["bn2_g"], params["bn2_b"])
    out2 = bn_relu(conv(out, params["conv3"], c_out, c_out, 2), params["bn3_g"], params["bn3_b"])
    return out, out2


if __name__ == "__main__":
    key = jax.random.PRNGKey(0)
    k_arr, k_x, k_c1, k_c2, k_c3 = jax.random.split(key, 5)

    length, in_ch, out_ch = 8, 4, 8
    N, H, W = 2, 16, 16

    array = jax.random.normal(k_arr, (length,), jnp.float32)
    x = jax.random.normal(k_x, (N, in_ch, H, W), jnp.float32)

    params = dict(
        conv1=make_mconv_params(k_c1, length, in_ch, out_ch),
        conv2=make_mconv_params(k_c2, length, out_ch, out_ch),
        conv3=make_mconv_params(k_c3, length, out_ch, out_ch),
        bn1_g=jnp.ones((out_ch,), jnp.float32), bn1_b=jnp.zeros((out_ch,), jnp.float32),
        bn2_g=jnp.ones((out_ch,), jnp.float32), bn2_b=jnp.zeros((out_ch,), jnp.float32),
        bn3_g=jnp.ones((out_ch,), jnp.float32), bn3_b=jnp.zeros((out_ch,), jnp.float32),
    )

    fwd = jax.jit(downsample_layer_forward)
    out, out2 = fwd(params, array, x)
    jax.block_until_ready((out, out2))

    assert out.shape == (N, out_ch, H, W), out.shape
    assert out2.shape == (N, out_ch, H // 2, W // 2), out2.shape
    assert bool(jnp.isfinite(out).all()) and bool(jnp.isfinite(out2).all())

    # Verify against the PyTorch-faithful reference (bias included there -- it
    # must cancel exactly under training-mode BatchNorm).
    ref_out, ref_out2 = jax.jit(_reference_forward)(params, array, x)
    jax.block_until_ready((ref_out, ref_out2))
    err1 = float(jnp.max(jnp.abs(out - ref_out)))
    err2 = float(jnp.max(jnp.abs(out2 - ref_out2)))
    assert err1 < 5e-2 and err2 < 5e-2, (err1, err2)

    print("KERNEL_OK")
</pallas_src>

<mosaic_0001>
module attributes {stable_mosaic.version = 11 : i64} {
  func.func @kernel(%arg0: memref<8x512xf32, #tpu.memory_space<vmem>>, %arg1: memref<8x72xf32, #tpu.memory_space<vmem>>, %arg2: memref<8x72xf32, #tpu.memory_space<vmem>>, %arg3: memref<8x72xf32, #tpu.memory_space<vmem>>, %arg4: memref<8x6xf32, #tpu.memory_space<vmem>>, %arg5: memref<256x64xf32, #tpu.memory_space<vmem>>, %arg6: memref<9x8x512xf32, #tpu.memory_space<vmem>>, %arg7: memref<2x8x256xf32, #tpu.memory_space<vmem>>, %arg8: memref<8x128xf32, #tpu.memory_space<vmem>>, %arg9: memref<72x512xf32, #tpu.memory_space<vmem>>) attributes {dimension_semantics = [], scalar_prefetch = 0 : i64, scratch_operands = 1 : i64, tpu.core_type = #tpu.core_type<tc>} {
    %c0 = arith.constant 0 : index
    %c0_0 = arith.constant 0 : index
    %0 = vector.load %arg4[%c0, %c0_0] : memref<8x6xf32, #tpu.memory_space<vmem>>, vector<8x6xf32>
    %c0_1 = arith.constant 0 : index
    %c0_2 = arith.constant 0 : index
    %1 = vector.load %arg0[%c0_1, %c0_2] : memref<8x512xf32, #tpu.memory_space<vmem>>, vector<8x512xf32>
    %c0_3 = arith.constant 0 : index
    %c0_4 = arith.constant 0 : index
    %2 = vector.load %arg1[%c0_3, %c0_4] : memref<8x72xf32, #tpu.memory_space<vmem>>, vector<8x72xf32>
    %c17_i32 = arith.constant 17 : i32
    %3 = tpu.dynamic_rotate %1 by %c17_i32 dim 1 : vector<8x512xf32>, i32 -> vector<8x512xf32>
    %c0_5 = arith.constant 0 : index
    %c0_6 = arith.constant 0 : index
    %c0_7 = arith.constant 0 : index
    %4 = vector.load %arg6[%c0_5, %c0_6, %c0_7] : memref<9x8x512xf32, #tpu.memory_space<vmem>>, vector<1x8x512xf32>
    %5 = vector.shape_cast %4 : vector<1x8x512xf32> to vector<8x512xf32>
    %6 = arith.mulf %3, %5 : vector<8x512xf32>
    %c0_8 = arith.constant 0 : index
    %c0_9 = arith.constant 0 : index
    %7 = vector.load %arg9[%c0_8, %c0_9] : memref<72x512xf32, #tpu.memory_space<vmem>>, vector<8x512xf32>
    tpu.vector_store %arg9[%c0_8, %c0_9], %6 {strides = array<i32>} : memref<72x512xf32, #tpu.memory_space<vmem>>, vector<8x512xf32>,
    %c16_i32 = arith.constant 16 : i32
    %8 = tpu.dynamic_rotate %1 by %c16_i32 dim 1 : vector<8x512xf32>, i32 -> vector<8x512xf32>
    %c1 = arith.constant 1 : index
    %c0_10 = arith.constant 0 : index
    %c0_11 = arith.constant 0 : index
    %9 = vector.load %arg6[%c1, %c0_10, %c0_11] : memref<9x8x512xf32, #tpu.memory_space<vmem>>, vector<1x8x512xf32>
    %10 = vector.shape_cast %9 : vector<1x8x512xf32> to vector<8x512xf32>
    %11 = arith.mulf %8, %10 : vector<8x512xf32>
    %c8 = arith.constant 8 : index
    %c0_12 = arith.constant 0 : index
    %12 = vector.load %arg9[%c8, %c0_12] : memref<72x512xf32, #tpu.memory_space<vmem>>, vector<8x512xf32>
    tpu.vector_store %arg9[%c8, %c0_12], %11 {strides = array<i32>} : memref<72x512xf32, #tpu.memory_space<vmem>>, vector<8x512xf32>,
    %c15_i32 = arith.constant 15 : i32
    %13 = tpu.dynamic_rotate %1 by %c15_i32 dim 1 : vector<8x512xf32>, i32 -> vector<8x512xf32>
    %c2 = arith.constant 2 : index
    %c0_13 = arith.constant 0 : index
    %c0_14 = arith.constant 0 : index
    %14 = vector.load %arg6[%c2, %c0_13, %c0_14] : memref<9x8x512xf32, #tpu.memory_space<vmem>>, vector<1x8x512xf32>
    %15 = vector.shape_cast %14 : vector<1x8x512xf32> to vector<8x512xf32>
    %16 = arith.mulf %13, %15 : vector<8x512xf32>
    %c16 = arith.constant 16 : index
    %c0_15 = arith.constant 0 : index
    %17 = vector.load %arg9[%c16, %c0_15] : memref<72x512xf32, #tpu.memory_space<vmem>>, vector<8x512xf32>
    tpu.vector_store %arg9[%c16, %c0_15], %16 {strides = array<i32>} : memref<72x512xf32, #tpu.memory_space<vmem>>, vector<8x512xf32>,
    %c1_i32 = arith.constant 1 : i32
    %18 = tpu.dynamic_rotate %1 by %c1_i32 dim 1 : vector<8x512xf32>, i32 -> vector<8x512xf32>
    %c3 = arith.constant 3 : index
    %c0_16 = arith.constant 0 : index
    %c0_17 = arith.constant 0 : index
    %19 = vector.load %arg6[%c3, %c0_16, %c0_17] : memref<9x8x512xf32, #tpu.memory_space<vmem>>, vector<1x8x512xf32>
    %20 = vector.shape_cast %19 : vector<1x8x512xf32> to vector<8x512xf32>
    %21 = arith.mulf %18, %20 : vector<8x512xf32>
    %c24 = arith.constant 24 : index
    %c0_18 = arith.constant 0 : index
    %22 = vector.load %arg9[%c24, %c0_18] : memref<72x512xf32, #tpu.memory_space<vmem>>, vector<8x512xf32>
    tpu.vector_store %arg9[%c24, %c0_18], %21 {strides = array<i32>} : memref<72x512xf32, #tpu.memory_space<vmem>>, vector<8x512xf32>,
    %c4 = arith.constant 4 : index
    %c0_19 = arith.constant 0 : index
    %c0_20 = arith.constant 0 : index
    %23 = vector.load %arg6[%c4, %c0_19, %c0_20] : memref<9x8x512xf32, #tpu.memory_space<vmem>>, vector<1x8x512xf32>
    %24 = vector.shape_cast %23 : vector<1x8x512xf32> to vector<8x512xf32>
    %25 = arith.mulf %1, %24 : vector<8x512xf32>
    %c32 = arith.constant 32 : index
    %c0_21 = arith.constant 0 : index
    %26 = vector.load %arg9[%c32, %c0_21] : memref<72x512xf32, #tpu.memory_space<vmem>>, vector<8x512xf32>
    tpu.vector_store %arg9[%c32, %c0_21], %25 {strides = array<i32>} : memref<72x512xf32, #tpu.memory_space<vmem>>, vector<8x512xf32>,
    %c511_i32 = arith.constant 511 : i32
    %27 = tpu.dynamic_rotate %1 by %c511_i32 dim 1 : vector<8x512xf32>, i32 -> vector<8x512xf32>
    %c5 = arith.constant 5 : index
    %c0_22 = arith.constant 0 : index
    %c0_23 = arith.constant 0 : index
    %28 = vector.load %arg6[%c5, %c0_22, %c0_23] : memref<9x8x512xf32, #tpu.memory_space<vmem>>, vector<1x8x512xf32>
    %29 = vector.shape_cast %28 : vector<1x8x512xf32> to vector<8x512xf32>
    %30 = arith.mulf %27, %29 : vector<8x512xf32>
    %c40 = arith.constant 40 : index
    %c0_24 = arith.constant 0 : index
    %31 = vector.load %arg9[%c40, %c0_24] : memref<72x512xf32, #tpu.memory_space<vmem>>, vector<8x512xf32>
    tpu.vector_store %arg9[%c40, %c0_24], %30 {strides = array<i32>} : memref<72x512xf32, #tpu.memory_space<vmem>>, vector<8x512xf32>,
    %c497_i32 = arith.constant 497 : i32
    %32 = tpu.dynamic_rotate %1 by %c497_i32 dim 1 : vector<8x512xf32>, i32 -> vector<8x512xf32>
    %c6 = arith.constant 6 : index
    %c0_25 = arith.constant 0 : index
    %c0_26 = arith.constant 0 : index
    %33 = vector.load %arg6[%c6, %c0_25, %c0_26] : memref<9x8x512xf32, #tpu.memory_space<vmem>>, vector<1x8x512xf32>
    %34 = vector.shape_cast %33 : vector<1x8x512xf32> to vector<8x512xf32>
    %35 = arith.mulf %32, %34 : vector<8x512xf32>
    %c48 = arith.constant 48 : index
    %c0_27 = arith.constant 0 : index
    %36 = vector.load %arg9[%c48, %c0_27] : memref<72x512xf32, #tpu.memory_space<vmem>>, vector<8x512xf32>
    tpu.vector_store %arg9[%c48, %c0_27], %35 {strides = array<i32>} : memref<72x512xf32, #tpu.memory_space<vmem>>, vector<8x512xf32>,
    %c496_i32 = arith.constant 496 : i32
    %37 = tpu.dynamic_rotate %1 by %c496_i32 dim 1 : vector<8x512xf32>, i32 -> vector<8x512xf32>
    %c7 = arith.constant 7 : index
    %c0_28 = arith.constant 0 : index
    %c0_29 = arith.constant 0 : index
    %38 = vector.load %arg6[%c7, %c0_28, %c0_29] : memref<9x8x512xf32, #tpu.memory_space<vmem>>, vector<1x8x512xf32>
    %39 = vector.shape_cast %38 : vector<1x8x512xf32> to vector<8x512xf32>
    %40 = arith.mulf %37, %39 : vector<8x512xf32>
    %c56 = arith.constant 56 : index
    %c0_30 = arith.constant 0 : index
    %41 = vector.load %arg9[%c56, %c0_30] : memref<72x512xf32, #tpu.memory_space<vmem>>, vector<8x512xf32>
    tpu.vector_store %arg9[%c56, %c0_30], %40 {strides = array<i32>} : memref<72x512xf32, #tpu.memory_space<vmem>>, vector<8x512xf32>,
    %c495_i32 = arith.constant 495 : i32
    %42 = tpu.dynamic_rotate %1 by %c495_i32 dim 1 : vector<8x512xf32>, i32 -> vector<8x512xf32>
    %c8_31 = arith.constant 8 : index
    %c0_32 = arith.constant 0 : index
    %c0_33 = arith.constant 0 : index
    %43 = vector.load %arg6[%c8_31, %c0_32, %c0_33] : memref<9x8x512xf32, #tpu.memory_space<vmem>>, vector<1x8x512xf32>
    %44 = vector.shape_cast %43 : vector<1x8x512xf32> to vector<8x512xf32>
    %45 = arith.mulf %42, %44 : vector<8x512xf32>
    %c64 = arith.constant 64 : index
    %c0_34 = arith.constant 0 : index
    %46 = vector.load %arg9[%c64, %c0_34] : memref<72x512xf32, #tpu.memory_space<vmem>>, vector<8x512xf32>
    tpu.vector_store %arg9[%c64, %c0_34], %45 {strides = array<i32>} : memref<72x512xf32, #tpu.memory_space<vmem>>, vector<8x512xf32>,
    %c0_35 = arith.constant 0 : index
    %c0_36 = arith.constant 0 : index
    %47 = vector.load %arg9[%c0_35, %c0_36] : memref<72x512xf32, #tpu.memory_space<vmem>>, vector<72x512xf32>
    %cst = arith.constant dense<0.000000e+00> : vector<8x512xf32>
    %48 = tpu.matmul %2, %47, %cst {dimension_numbers = #tpu.dot_dimension_numbers<[1], [0], [0], [1], [0, 0, 1, 1], [], []>} : vector<8x72xf32>, vector<72x512xf32>, vector<8x512xf32> -> vector<8x512xf32>
    %49 = vector.extract_strided_slice %0 {offsets = [0, 0], sizes = [8, 1], strides = [1, 1]} : vector<8x6xf32> to vector<8x1xf32>
    %50 = vector.extract_strided_slice %0 {offsets = [0, 1], sizes = [8, 1], strides = [1, 1]} : vector<8x6xf32> to vector<8x1xf32>
    %cst_37 = arith.constant dense<0.000000e+00> : vector<8xf32>
    %51 = vector.multi_reduction <add>, %48, %cst_37 [1] : vector<8x512xf32> to vector<8xf32>
    %52 = vector.shape_cast %51 : vector<8xf32> to vector<8x1xf32>
    %cst_38 = arith.constant 0.001953125 : f32
    %53 = vector.broadcast %cst_38 : f32 to vector<8x1xf32>
    %54 = arith.mulf %52, %53 : vector<8x1xf32>
    %55 = vector.broadcast %54 : vector<8x1xf32> to vector<8x512xf32>
    %56 = arith.subf %48, %55 : vector<8x512xf32>
    %57 = arith.mulf %56, %56 : vector<8x512xf32>
    %cst_39 = arith.constant dense<0.000000e+00> : vector<8xf32>
    %58 = vector.multi_reduction <add>, %57, %cst_39 [1] : vector<8x512xf32> to vector<8xf32>
    %59 = vector.shape_cast %58 : vector<8xf32> to vector<8x1xf32>
    %cst_40 = arith.constant 0.001953125 : f32
    %60 = vector.broadcast %cst_40 : f32 to vector<8x1xf32>
    %61 = arith.mulf %59, %60 : vector<8x1xf32>
    %cst_41 = arith.constant 9.99999974E-6 : f32
    %62 = vector.broadcast %cst_41 : f32 to vector<8x1xf32>
    %63 = arith.addf %61, %62 : vector<8x1xf32>
    %64 = math.rsqrt %63 : vector<8x1xf32>
    %65 = vector.broadcast %64 : vector<8x1xf32> to vector<8x512xf32>
    %66 = arith.mulf %56, %65 : vector<8x512xf32>
    %67 = vector.broadcast %49 : vector<8x1xf32> to vector<8x512xf32>
    %68 = arith.mulf %66, %67 : vector<8x512xf32>
    %69 = vector.broadcast %50 : vector<8x1xf32> to vector<8x512xf32>
    %70 = arith.addf %68, %69 : vector<8x512xf32>
    %cst_42 = arith.constant 0.000000e+00 : f32
    %71 = vector.broadcast %cst_42 : f32 to vector<8x512xf32>
    %72 = arith.maximumf %70, %71 : vector<8x512xf32>
    %c0_43 = arith.constant 0 : index
    %c0_44 = arith.constant 0 : index
    %73 = vector.load %arg2[%c0_43, %c0_44] : memref<8x72xf32, #tpu.memory_space<vmem>>, vector<8x72xf32>
    %c17_i32_45 = arith.constant 17 : i32
    %74 = tpu.dynamic_rotate %72 by %c17_i32_45 dim 1 : vector<8x512xf32>, i32 -> vector<8x512xf32>
    %c0_46 = arith.constant 0 : index
    %c0_47 = arith.constant 0 : index
    %c0_48 = arith.constant 0 : index
    %75 = vector.load %arg6[%c0_46, %c0_47, %c0_48] : memref<9x8x512xf32, #tpu.memory_space<vmem>>, vector<1x8x512xf32>
    %76 = vector.shape_cast %75 : vector<1x8x512xf32> to vector<8x512xf32>
    %77 = arith.mulf %74, %76 : vector<8x512xf32>
    %c0_49 = arith.constant 0 : index
    %c0_50 = arith.constant 0 : index
    %78 = vector.load %arg9[%c0_49, %c0_50] : memref<72x512xf32, #tpu.memory_space<vmem>>, vector<8x512xf32>
    tpu.vector_store %arg9[%c0_49, %c0_50], %77 {strides = array<i32>} : memref<72x512xf32, #tpu.memory_space<vmem>>, vector<8x512xf32>,
    %c16_i32_51 = arith.constant 16 : i32
    %79 = tpu.dynamic_rotate %72 by %c16_i32_51 dim 1 : vector<8x512xf32>, i32 -> vector<8x512xf32>
    %c1_52 = arith.constant 1 : index
    %c0_53 = arith.constant 0 : index
    %c0_54 = arith.constant 0 : index
    %80 = vector.load %arg6[%c1_52, %c0_53, %c0_54] : memref<9x8x512xf32, #tpu.memory_space<vmem>>, vector<1x8x512xf32>
    %81 = vector.shape_cast %80 : vector<1x8x512xf32> to vector<8x512xf32>
    %82 = arith.mulf %79, %81 : vector<8x512xf32>
    %c8_55 = arith.constant 8 : index
    %c0_56 = arith.constant 0 : index
    %83 = vector.load %arg9[%c8_55, %c0_56] : memref<72x512xf32, #tpu.memory_space<vmem>>, vector<8x512xf32>
    tpu.vector_store %arg9[%c8_55, %c0_56], %82 {strides = array<i32>} : memref<72x512xf32, #tpu.memory_space<vmem>>, vector<8x512xf32>,
    %c15_i32_57 = arith.constant 15 : i32
    %84 = tpu.dynamic_rotate %72 by %c15_i32_57 dim 1 : vector<8x512xf32>, i32 -> vector<8x512xf32>
    %c2_58 = arith.constant 2 : index
    %c0_59 = arith.constant 0 : index
    %c0_60 = arith.constant 0 : index
    %85 = vector.load %arg6[%c2_58, %c0_59, %c0_60] : memref<9x8x512xf32, #tpu.memory_space<vmem>>, vector<1x8x512xf32>
    %86 = vector.shape_cast %85 : vector<1x8x512xf32> to vector<8x512xf32>
    %87 = arith.mulf %84, %86 : vector<8x512xf32>
    %c16_61 = arith.constant 16 : index
    %c0_62 = arith.constant 0 : index
    %88 = vector.load %arg9[%c16_61, %c0_62] : memref<72x512xf32, #tpu.memory_space<vmem>>, vector<8x512xf32>
    tpu.vector_store %arg9[%c16_61, %c0_62], %87 {strides = array<i32>} : memref<72x512xf32, #tpu.memory_space<vmem>>, vector<8x512xf32>,
    %c1_i32_63 = arith.constant 1 : i32
    %89 = tpu.dynamic_rotate %72 by %c1_i32_63 dim 1 : vector<8x512xf32>, i32 -> vector<8x512xf32>
    %c3_64 = arith.constant 3 : index
    %c0_65 = arith.constant 0 : index
    %c0_66 = arith.constant 0 : index
    %90 = vector.load %arg6[%c3_64, %c0_65, %c0_66] : memref<9x8x512xf32, #tpu.memory_space<vmem>>, vector<1x8x512xf32>
    %91 = vector.shape_cast %90 : vector<1x8x512xf32> to vector<8x512xf32>
    %92 = arith.mulf %89, %91 : vector<8x512xf32>
    %c24_67 = arith.constant 24 : index
    %c0_68 = arith.constant 0 : index
    %93 = vector.load %arg9[%c24_67, %c0_68] : memref<72x512xf32, #tpu.memory_space<vmem>>, vector<8x512xf32>
    tpu.vector_store %arg9[%c24_67, %c0_68], %92 {strides = array<i32>} : memref<72x512xf32, #tpu.memory_space<vmem>>, vector<8x512xf32>,
    %c4_69 = arith.constant 4 : index
    %c0_70 = arith.constant 0 : index
    %c0_71 = arith.constant 0 : index
    %94 = vector.load %arg6[%c4_69, %c0_70, %c0_71] : memref<9x8x512xf32, #tpu.memory_space<vmem>>, vector<1x8x512xf32>
    %95 = vector.shape_cast %94 : vector<1x8x512xf32> to vector<8x512xf32>
    %96 = arith.mulf %72, %95 : vector<8x512xf32>
    %c32_72 = arith.constant 32 : index
    %c0_73 = arith.constant 0 : index
    %97 = vector.load %arg9[%c32_72, %c0_73] : memref<72x512xf32, #tpu.memory_space<vmem>>, vector<8x512xf32>
    tpu.vector_store %arg9[%c32_72, %c0_73], %96 {strides = array<i32>} : memref<72x512xf32, #tpu.memory_space<vmem>>, vector<8x512xf32>,
    %c511_i32_74 = arith.constant 511 : i32
    %98 = tpu.dynamic_rotate %72 by %c511_i32_74 dim 1 : vector<8x512xf32>, i32 -> vector<8x512xf32>
    %c5_75 = arith.constant 5 : index
    %c0_76 = arith.constant 0 : index
    %c0_77 = arith.constant 0 : index
    %99 = vector.load %arg6[%c5_75, %c0_76, %c0_77] : memref<9x8x512xf32, #tpu.memory_space<vmem>>, vector<1x8x512xf32>
    %100 = vector.shape_cast %99 : vector<1x8x512xf32> to vector<8x512xf32>
    %101 = arith.mulf %98, %100 : vector<8x512xf32>
    %c40_78 = arith.constant 40 : index
    %c0_79 = arith.constant 0 : index
    %102 = vector.load %arg9[%c40_78, %c0_79] : memref<72x512xf32, #tpu.memory_space<vmem>>, vector<8x512xf32>
    tpu.vector_store %arg9[%c40_78, %c0_79], %101 {strides = array<i32>} : memref<72x512xf32, #tpu.memory_space<vmem>>, vector<8x512xf32>,
    %c497_i32_80 = arith.constant 497 : i32
    %103 = tpu.dynamic_rotate %72 by %c497_i32_80 dim 1 : vector<8x512xf32>, i32 -> vector<8x512xf32>
    %c6_81 = arith.constant 6 : index
    %c0_82 = arith.constant 0 : index
    %c0_83 = arith.constant 0 : index
    %104 = vector.load %arg6[%c6_81, %c0_82, %c0_83] : memref<9x8x512xf32, #tpu.memory_space<vmem>>, vector<1x8x512xf32>
    %105 = vector.shape_cast %104 : vector<1x8x512xf32> to vector<8x512xf32>
    %106 = arith.mulf %103, %105 : vector<8x512xf32>
    %c48_84 = arith.constant 48 : index
    %c0_85 = arith.constant 0 : index
    %107 = vector.load %arg9[%c48_84, %c0_85] : memref<72x512xf32, #tpu.memory_space<vmem>>, vector<8x512xf32>
    tpu.vector_store %arg9[%c48_84, %c0_85], %106 {strides = array<i32>} : memref<72x512xf32, #tpu.memory_space<vmem>>, vector<8x512xf32>,
    %c496_i32_86 = arith.constant 496 : i32
    %108 = tpu.dynamic_rotate %72 by %c496_i32_86 dim 1 : vector<8x512xf32>, i32 -> vector<8x512xf32>
    %c7_87 = arith.constant 7 : index
    %c0_88 = arith.constant 0 : index
    %c0_89 = arith.constant 0 : index
    %109 = vector.load %arg6[%c7_87, %c0_88, %c0_89] : memref<9x8x512xf32, #tpu.memory_space<vmem>>, vector<1x8x512xf32>
    %110 = vector.shape_cast %109 : vector<1x8x512xf32> to vector<8x512xf32>
    %111 = arith.mulf %108, %110 : vector<8x512xf32>
    %c56_90 = arith.constant 56 : index
    %c0_91 = arith.constant 0 : index
    %112 = vector.load %arg9[%c56_90, %c0_91] : memref<72x512xf32, #tpu.memory_space<vmem>>, vector<8x512xf32>
    tpu.vector_store %arg9[%c56_90, %c0_91], %111 {strides = array<i32>} : memref<72x512xf32, #tpu.memory_space<vmem>>, vector<8x512xf32>,
    %c495_i32_92 = arith.constant 495 : i32
    %113 = tpu.dynamic_rotate %72 by %c495_i32_92 dim 1 : vector<8x512xf32>, i32 -> vector<8x512xf32>
    %c8_93 = arith.constant 8 : index
    %c0_94 = arith.constant 0 : index
    %c0_95 = arith.constant 0 : index
    %114 = vector.load %arg6[%c8_93, %c0_94, %c0_95] : memref<9x8x512xf32, #tpu.memory_space<vmem>>, vector<1x8x512xf32>
    %115 = vector.shape_cast %114 : vector<1x8x512xf32> to vector<8x512xf32>
    %116 = arith.mulf %113, %115 : vector<8x512xf32>
    %c64_96 = arith.constant 64 : index
    %c0_97 = arith.constant 0 : index
    %117 = vector.load %arg9[%c64_96, %c0_97] : memref<72x512xf32, #tpu.memory_space<vmem>>, vector<8x512xf32>
    tpu.vector_store %arg9[%c64_96, %c0_97], %116 {strides = array<i32>} : memref<72x512xf32, #tpu.memory_space<vmem>>, vector<8x512xf32>,
    %c0_98 = arith.constant 0 : index
    %c0_99 = arith.constant 0 : index
    %118 = vector.load %arg9[%c0_98, %c0_99] : memref<72x512xf32, #tpu.memory_space<vmem>>, vector<72x512xf32>
    %cst_100 = arith.constant dense<0.000000e+00> : vector<8x512xf32>
    %119 = tpu.matmul %73, %118, %cst_100 {dimension_numbers = #tpu.dot_dimension_numbers<[1], [0], [0], [1], [0, 0, 1, 1], [], []>} : vector<8x72xf32>, vector<72x512xf32>, vector<8x512xf32> -> vector<8x512xf32>
    %120 = vector.extract_strided_slice %0 {offsets = [0, 2], sizes = [8, 1], strides = [1, 1]} : vector<8x6xf32> to vector<8x1xf32>
    %121 = vector.extract_strided_slice %0 {offsets = [0, 3], sizes = [8, 1], strides = [1, 1]} : vector<8x6xf32> to vector<8x1xf32>
    %cst_101 = arith.constant dense<0.000000e+00> : vector<8xf32>
    %122 = vector.multi_reduction <add>, %119, %cst_101 [1] : vector<8x512xf32> to vector<8xf32>
    %123 = vector.shape_cast %122 : vector<8xf32> to vector<8x1xf32>
    %cst_102 = arith.constant 0.001953125 : f32
    %124 = vector.broadcast %cst_102 : f32 to vector<8x1xf32>
    %125 = arith.mulf %123, %124 : vector<8x1xf32>
    %126 = vector.broadcast %125 : vector<8x1xf32> to vector<8x512xf32>
    %127 = arith.subf %119, %126 : vector<8x512xf32>
    %128 = arith.mulf %127, %127 : vector<8x512xf32>
    %cst_103 = arith.constant dense<0.000000e+00> : vector<8xf32>
    %129 = vector.multi_reduction <add>, %128, %cst_103 [1] : vector<8x512xf32> to vector<8xf32>
    %130 = vector.shape_cast %129 : vector<8xf32> to vector<8x1xf32>
    %cst_104 = arith.constant 0.001953125 : f32
    %131 = vector.broadcast %cst_104 : f32 to vector<8x1xf32>
    %132 = arith.mulf %130, %131 : vector<8x1xf32>
    %cst_105 = arith.constant 9.99999974E-6 : f32
    %133 = vector.broadcast %cst_105 : f32 to vector<8x1xf32>
    %134 = arith.addf %132, %133 : vector<8x1xf32>
    %135 = math.rsqrt %134 : vector<8x1xf32>
    %136 = vector.broadcast %135 : vector<8x1xf32> to vector<8x512xf32>
    %137 = arith.mulf %127, %136 : vector<8x512xf32>
    %138 = vector.broadcast %120 : vector<8x1xf32> to vector<8x512xf32>
    %139 = arith.mulf %137, %138 : vector<8x512xf32>
    %140 = vector.broadcast %121 : vector<8x1xf32> to vector<8x512xf32>
    %141 = arith.addf %139, %140 : vector<8x512xf32>
    %cst_106 = arith.constant 0.000000e+00 : f32
    %142 = vector.broadcast %cst_106 : f32 to vector<8x512xf32>
    %143 = arith.maximumf %141, %142 : vector<8x512xf32>
    %144 = vector.extract_strided_slice %143 {offsets = [0, 0], sizes = [8, 256], strides = [1, 1]} : vector<8x512xf32> to vector<8x256xf32>
    %c0_107 = arith.constant 0 : index
    %c0_108 = arith.constant 0 : index
    %c0_109 = arith.constant 0 : index
    %145 = vector.load %arg7[%c0_107, %c0_108, %c0_109] : memref<2x8x256xf32, #tpu.memory_space<vmem>>, vector<1x8x256xf32>
    %146 = vector.shape_cast %145 : vector<1x8x256xf32> to vector<8x256xf32>
    %147 = vector.shape_cast %144 : vector<8x256xf32> to vector<1x8x256xf32>
    tpu.vector_store %arg7[%c0_107, %c0_108, %c0_109], %147 {strides = array<i32>} : memref<2x8x256xf32, #tpu.memory_space<vmem>>, vector<1x8x256xf32>,
    %148 = vector.extract_strided_slice %143 {offsets = [0, 256], sizes = [8, 256], strides = [1, 1]} : vector<8x512xf32> to vector<8x256xf32>
    %c1_110 = arith.constant 1 : index
    %c0_111 = arith.constant 0 : index
    %c0_112 = arith.constant 0 : index
    %149 = vector.load %arg7[%c1_110, %c0_111, %c0_112] : memref<2x8x256xf32, #tpu.memory_space<vmem>>, vector<1x8x256xf32>
    %150 = vector.shape_cast %149 : vector<1x8x256xf32> to vector<8x256xf32>
    %151 = vector.shape_cast %148 : vector<8x256xf32> to vector<1x8x256xf32>
    tpu.vector_store %arg7[%c1_110, %c0_111, %c0_112], %151 {strides = array<i32>} : memref<2x8x256xf32, #tpu.memory_space<vmem>>, vector<1x8x256xf32>,
    %c0_113 = arith.constant 0 : index
    %c0_114 = arith.constant 0 : index
    %152 = vector.load %arg3[%c0_113, %c0_114] : memref<8x72xf32, #tpu.memory_space<vmem>>, vector<8x72xf32>
    %c17_i32_115 = arith.constant 17 : i32
    %153 = tpu.dynamic_rotate %143 by %c17_i32_115 dim 1 : vector<8x512xf32>, i32 -> vector<8x512xf32>
    %c0_116 = arith.constant 0 : index
    %c0_117 = arith.constant 0 : index
    %c0_118 = arith.constant 0 : index
    %154 = vector.load %arg6[%c0_116, %c0_117, %c0_118] : memref<9x8x512xf32, #tpu.memory_space<vmem>>, vector<1x8x512xf32>
    %155 = vector.shape_cast %154 : vector<1x8x512xf32> to vector<8x512xf32>
    %156 = arith.mulf %153, %155 : vector<8x512xf32>
    %c0_119 = arith.constant 0 : index
    %c0_120 = arith.constant 0 : index
    %157 = vector.load %arg9[%c0_119, %c0_120] : memref<72x512xf32, #tpu.memory_space<vmem>>, vector<8x512xf32>
    tpu.vector_store %arg9[%c0_119, %c0_120], %156 {strides = array<i32>} : memref<72x512xf32, #tpu.memory_space<vmem>>, vector<8x512xf32>,
    %c16_i32_121 = arith.constant 16 : i32
    %158 = tpu.dynamic_rotate %143 by %c16_i32_121 dim 1 : vector<8x512xf32>, i32 -> vector<8x512xf32>
    %c1_122 = arith.constant 1 : index
    %c0_123 = arith.constant 0 : index
    %c0_124 = arith.constant 0 : index
    %159 = vector.load %arg6[%c1_122, %c0_123, %c0_124] : memref<9x8x512xf32, #tpu.memory_space<vmem>>, vector<1x8x512xf32>
    %160 = vector.shape_cast %159 : vector<1x8x512xf32> to vector<8x512xf32>
    %161 = arith.mulf %158, %160 : vector<8x512xf32>
    %c8_125 = arith.constant 8 : index
    %c0_126 = arith.constant 0 : index
    %162 = vector.load %arg9[%c8_125, %c0_126] : memref<72x512xf32, #tpu.memory_space<vmem>>, vector<8x512xf32>
    tpu.vector_store %arg9[%c8_125, %c0_126], %161 {strides = array<i32>} : memref<72x512xf32, #tpu.memory_space<vmem>>, vector<8x512xf32>,
    %c15_i32_127 = arith.constant 15 : i32
    %163 = tpu.dynamic_rotate %143 by %c15_i32_127 dim 1 : vector<8x512xf32>, i32 -> vector<8x512xf32>
    %c2_128 = arith.constant 2 : index
    %c0_129 = arith.constant 0 : index
    %c0_130 = arith.constant 0 : index
    %164 = vector.load %arg6[%c2_128, %c0_129, %c0_130] : memref<9x8x512xf32, #tpu.memory_space<vmem>>, vector<1x8x512xf32>
    %165 = vector.shape_cast %164 : vector<1x8x512xf32> to vector<8x512xf32>
    %166 = arith.mulf %163, %165 : vector<8x512xf32>
    %c16_131 = arith.constant 16 : index
    %c0_132 = arith.constant 0 : index
    %167 = vector.load %arg9[%c16_131, %c0_132] : memref<72x512xf32, #tpu.memory_space<vmem>>, vector<8x512xf32>
    tpu.vector_store %arg9[%c16_131, %c0_132], %166 {strides = array<i32>} : memref<72x512xf32, #tpu.memory_space<vmem>>, vector<8x512xf32>,
    %c1_i32_133 = arith.constant 1 : i32
    %168 = tpu.dynamic_rotate %143 by %c1_i32_133 dim 1 : vector<8x512xf32>, i32 -> vector<8x512xf32>
    %c3_134 = arith.constant 3 : index
    %c0_135 = arith.constant 0 : index
    %c0_136 = arith.constant 0 : index
    %169 = vector.load %arg6[%c3_134, %c0_135, %c0_136] : memref<9x8x512xf32, #tpu.memory_space<vmem>>, vector<1x8x512xf32>
    %170 = vector.shape_cast %169 : vector<1x8x512xf32> to vector<8x512xf32>
    %171 = arith.mulf %168, %170 : vector<8x512xf32>
    %c24_137 = arith.constant 24 : index
    %c0_138 = arith.constant 0 : index
    %172 = vector.load %arg9[%c24_137, %c0_138] : memref<72x512xf32, #tpu.memory_space<vmem>>, vector<8x512xf32>
    tpu.vector_store %arg9[%c24_137, %c0_138], %171 {strides = array<i32>} : memref<72x512xf32, #tpu.memory_space<vmem>>, vector<8x512xf32>,
    %c4_139 = arith.constant 4 : index
    %c0_140 = arith.constant 0 : index
    %c0_141 = arith.constant 0 : index
    %173 = vector.load %arg6[%c4_139, %c0_140, %c0_141] : memref<9x8x512xf32, #tpu.memory_space<vmem>>, vector<1x8x512xf32>
    %174 = vector.shape_cast %173 : vector<1x8x512xf32> to vector<8x512xf32>
    %175 = arith.mulf %143, %174 : vector<8x512xf32>
    %c32_142 = arith.constant 32 : index
    %c0_143 = arith.constant 0 : index
    %176 = vector.load %arg9[%c32_142, %c0_143] : memref<72x512xf32, #tpu.memory_space<vmem>>, vector<8x512xf32>
    tpu.vector_store %arg9[%c32_142, %c0_143], %175 {strides = array<i32>} : memref<72x512xf32, #tpu.memory_space<vmem>>, vector<8x512xf32>,
    %c511_i32_144 = arith.constant 511 : i32
    %177 = tpu.dynamic_rotate %143 by %c511_i32_144 dim 1 : vector<8x512xf32>, i32 -> vector<8x512xf32>
    %c5_145 = arith.constant 5 : index
    %c0_146 = arith.constant 0 : index
    %c0_147 = arith.constant 0 : index
    %178 = vector.load %arg6[%c5_145, %c0_146, %c0_147] : memref<9x8x512xf32, #tpu.memory_space<vmem>>, vector<1x8x512xf32>
    %179 = vector.shape_cast %178 : vector<1x8x512xf32> to vector<8x512xf32>
    %180 = arith.mulf %177, %179 : vector<8x512xf32>
    %c40_148 = arith.constant 40 : index
    %c0_149 = arith.constant 0 : index
    %181 = vector.load %arg9[%c40_148, %c0_149] : memref<72x512xf32, #tpu.memory_space<vmem>>, vector<8x512xf32>
    tpu.vector_store %arg9[%c40_148, %c0_149], %180 {strides = array<i32>} : memref<72x512xf32, #tpu.memory_space<vmem>>, vector<8x512xf32>,
    %c497_i32_150 = arith.constant 497 : i32
    %182 = tpu.dynamic_rotate %143 by %c497_i32_150 dim 1 : vector<8x512xf32>, i32 -> vector<8x512xf32>
    %c6_151 = arith.constant 6 : index
    %c0_152 = arith.constant 0 : index
    %c0_153 = arith.constant 0 : index
    %183 = vector.load %arg6[%c6_151, %c0_152, %c0_153] : memref<9x8x512xf32, #tpu.memory_space<vmem>>, vector<1x8x512xf32>
    %184 = vector.shape_cast %183 : vector<1x8x512xf32> to vector<8x512xf32>
    %185 = arith.mulf %182, %184 : vector<8x512xf32>
    %c48_154 = arith.constant 48 : index
    %c0_155 = arith.constant 0 : index
    %186 = vector.load %arg9[%c48_154, %c0_155] : memref<72x512xf32, #tpu.memory_space<vmem>>, vector<8x512xf32>
    tpu.vector_store %arg9[%c48_154, %c0_155], %185 {strides = array<i32>} : memref<72x512xf32, #tpu.memory_space<vmem>>, vector<8x512xf32>,
    %c496_i32_156 = arith.constant 496 : i32
    %187 = tpu.dynamic_rotate %143 by %c496_i32_156 dim 1 : vector<8x512xf32>, i32 -> vector<8x512xf32>
    %c7_157 = arith.constant 7 : index
    %c0_158 = arith.constant 0 : index
    %c0_159 = arith.constant 0 : index
    %188 = vector.load %arg6[%c7_157, %c0_158, %c0_159] : memref<9x8x512xf32, #tpu.memory_space<vmem>>, vector<1x8x512xf32>
    %189 = vector.shape_cast %188 : vector<1x8x512xf32> to vector<8x512xf32>
    %190 = arith.mulf %187, %189 : vector<8x512xf32>
    %c56_160 = arith.constant 56 : index
    %c0_161 = arith.constant 0 : index
    %191 = vector.load %arg9[%c56_160, %c0_161] : memref<72x512xf32, #tpu.memory_space<vmem>>, vector<8x512xf32>
    tpu.vector_store %arg9[%c56_160, %c0_161], %190 {strides = array<i32>} : memref<72x512xf32, #tpu.memory_space<vmem>>, vector<8x512xf32>,
    %c495_i32_162 = arith.constant 495 : i32
    %192 = tpu.dynamic_rotate %143 by %c495_i32_162 dim 1 : vector<8x512xf32>, i32 -> vector<8x512xf32>
    %c8_163 = arith.constant 8 : index
    %c0_164 = arith.constant 0 : index
    %c0_165 = arith.constant 0 : index
    %193 = vector.load %arg6[%c8_163, %c0_164, %c0_165] : memref<9x8x512xf32, #tpu.memory_space<vmem>>, vector<1x8x512xf32>
    %194 = vector.shape_cast %193 : vector<1x8x512xf32> to vector<8x512xf32>
    %195 = arith.mulf %192, %194 : vector<8x512xf32>
    %c64_166 = arith.constant 64 : index
    %c0_167 = arith.constant 0 : index
    %196 = vector.load %arg9[%c64_166, %c0_167] : memref<72x512xf32, #tpu.memory_space<vmem>>, vector<8x512xf32>
    tpu.vector_store %arg9[%c64_166, %c0_167], %195 {strides = array<i32>} : memref<72x512xf32, #tpu.memory_space<vmem>>, vector<8x512xf32>,
    %c0_168 = arith.constant 0 : index
    %c0_169 = arith.constant 0 : index
    %197 = vector.load %arg9[%c0_168, %c0_169] : memref<72x512xf32, #tpu.memory_space<vmem>>, vector<72x512xf32>
    %cst_170 = arith.constant dense<0.000000e+00> : vector<8x512xf32>
    %198 = tpu.matmul %152, %197, %cst_170 {dimension_numbers = #tpu.dot_dimension_numbers<[1], [0], [0], [1], [0, 0, 1, 1], [], []>} : vector<8x72xf32>, vector<72x512xf32>, vector<8x512xf32> -> vector<8x512xf32>
    %c0_171 = arith.constant 0 : index
    %c0_172 = arith.constant 0 : index
    %199 = vector.load %arg5[%c0_171, %c0_172] : memref<256x64xf32, #tpu.memory_space<vmem>>, vector<256x64xf32>
    %200 = vector.extract_strided_slice %198 {offsets = [0, 0], sizes = [8, 256], strides = [1, 1]} : vector<8x512xf32> to vector<8x256xf32>
    %cst_173 = arith.constant dense<0.000000e+00> : vector<8x64xf32>
    %201 = tpu.matmul %200, %199, %cst_173 {dimension_numbers = #tpu.dot_dimension_numbers<[1], [0], [0], [1], [0, 0, 1, 1], [], []>} : vector<8x256xf32>, vector<256x64xf32>, vector<8x64xf32> -> vector<8x64xf32>
    %c0_174 = arith.constant 0 : index
    %c0_175 = arith.constant 0 : index
    %202 = vector.load %arg8[%c0_174, %c0_175] : memref<8x128xf32, #tpu.memory_space<vmem>>, vector<8x64xf32>
    tpu.vector_store %arg8[%c0_174, %c0_175], %201 {strides = array<i32>} : memref<8x128xf32, #tpu.memory_space<vmem>>, vector<8x64xf32>,
    %203 = vector.extract_strided_slice %198 {offsets = [0, 256], sizes = [8, 256], strides = [1, 1]} : vector<8x512xf32> to vector<8x256xf32>
    %cst_176 = arith.constant dense<0.000000e+00> : vector<8x64xf32>
    %204 = tpu.matmul %203, %199, %cst_176 {dimension_numbers = #tpu.dot_dimension_numbers<[1], [0], [0], [1], [0, 0, 1, 1], [], []>} : vector<8x256xf32>, vector<256x64xf32>, vector<8x64xf32> -> vector<8x64xf32>
    %c0_177 = arith.constant 0 : index
    %c64_178 = arith.constant 64 : index
    %205 = vector.load %arg8[%c0_177, %c64_178] : memref<8x128xf32, #tpu.memory_space<vmem>>, vector<8x64xf32>
    tpu.vector_store %arg8[%c0_177, %c64_178], %204 {strides = array<i32>} : memref<8x128xf32, #tpu.memory_space<vmem>>, vector<8x64xf32>,
    %c0_179 = arith.constant 0 : index
    %c0_180 = arith.constant 0 : index
    %206 = vector.load %arg8[%c0_179, %c0_180] : memref<8x128xf32, #tpu.memory_space<vmem>>, vector<8x128xf32>
    %207 = vector.extract_strided_slice %0 {offsets = [0, 4], sizes = [8, 1], strides = [1, 1]} : vector<8x6xf32> to vector<8x1xf32>
    %208 = vector.extract_strided_slice %0 {offsets = [0, 5], sizes = [8, 1], strides = [1, 1]} : vector<8x6xf32> to vector<8x1xf32>
    %cst_181 = arith.constant dense<0.000000e+00> : vector<8xf32>
    %209 = vector.multi_reduction <add>, %206, %cst_181 [1] : vector<8x128xf32> to vector<8xf32>
    %210 = vector.shape_cast %209 : vector<8xf32> to vector<8x1xf32>
    %cst_182 = arith.constant 7.812500e-03 : f32
    %211 = vector.broadcast %cst_182 : f32 to vector<8x1xf32>
    %212 = arith.mulf %210, %211 : vector<8x1xf32>
    %213 = vector.broadcast %212 : vector<8x1xf32> to vector<8x128xf32>
    %214 = arith.subf %206, %213 : vector<8x128xf32>
    %215 = arith.mulf %214, %214 : vector<8x128xf32>
    %cst_183 = arith.constant dense<0.000000e+00> : vector<8xf32>
    %216 = vector.multi_reduction <add>, %215, %cst_183 [1] : vector<8x128xf32> to vector<8xf32>
    %217 = vector.shape_cast %216 : vector<8xf32> to vector<8x1xf32>
    %cst_184 = arith.constant 7.812500e-03 : f32
    %218 = vector.broadcast %cst_184 : f32 to vector<8x1xf32>
    %219 = arith.mulf %217, %218 : vector<8x1xf32>
    %cst_185 = arith.constant 9.99999974E-6 : f32
    %220 = vector.broadcast %cst_185 : f32 to vector<8x1xf32>
    %221 = arith.addf %219, %220 : vector<8x1xf32>
    %222 = math.rsqrt %221 : vector<8x1xf32>
    %223 = vector.broadcast %222 : vector<8x1xf32> to vector<8x128xf32>
    %224 = arith.mulf %214, %223 : vector<8x128xf32>
    %225 = vector.broadcast %207 : vector<8x1xf32> to vector<8x128xf32>
    %226 = arith.mulf %224, %225 : vector<8x128xf32>
    %227 = vector.broadcast %208 : vector<8x1xf32> to vector<8x128xf32>
    %228 = arith.addf %226, %227 : vector<8x128xf32>
    %cst_186 = arith.constant 0.000000e+00 : f32
    %229 = vector.broadcast %cst_186 : f32 to vector<8x128xf32>
    %230 = arith.maximumf %228, %229 : vector<8x128xf32>
    %c0_187 = arith.constant 0 : index
    %c0_188 = arith.constant 0 : index
    %231 = vector.load %arg8[%c0_187, %c0_188] : memref<8x128xf32, #tpu.memory_space<vmem>>, vector<8x128xf32>
    tpu.vector_store %arg8[%c0_187, %c0_188], %230 {strides = array<i32>} : memref<8x128xf32, #tpu.memory_space<vmem>>, vector<8x128xf32>,
    return
  }
}

</mosaic_0001>

<bundles_post_ra>
// kernel: downsample_layer_forward.1
= control target key start
LH: loop header
LB: loop body
LE: loop exit
PB: predicated region body
PF: predicated region fallthrough
CT: control target
= control target key end

     0   :  { %s1726_s9 = smov 111   ;;  %s1727_s12 = smov 112   ;;  %v1733_v4 = vmov 0.0   ;;  %v42_v5 = vlaneseq  ;;  %vm292_vm8 = vcmask 588800   ;;  %vm1410_vm9 = vcmask 523264   ;;  %s2842_s0 = inlined_call_operand.vmem [shape: f32[8,512], index: 0, kind: input, shape index: {}]   ;;  %s2843_s6 = inlined_call_operand.vmem [shape: f32[9,8,512], index: 6, kind: input, shape index: {}]   ;;  %s2844_s1 = inlined_call_operand.vmem [shape: f32[8,72], index: 1, kind: input, shape index: {}]   ;;  %s2845_s4 = inlined_call_operand.vmem [shape: f32[8,6], index: 4, kind: input, shape index: {}]   ;;  %s2846_s2 = inlined_call_operand.vmem [shape: f32[8,72], index: 2, kind: input, shape index: {}]   ;;  %s2847_s7 = inlined_call_operand.vmem [shape: f32[2,8,256], index: 7, kind: output, shape index: {0}]   ;;  %s2848_s3 = inlined_call_operand.vmem [shape: f32[8,72], index: 3, kind: input, shape index: {}]   ;;  %s2849_s5 = inlined_call_operand.vmem [shape: f32[256,64], index: 5, kind: input, shape index: {}]   ;;  %s2850_s8 = inlined_call_operand.vmem [shape: f32[8,128], index: 8, kind: output, shape index: {1}]  }
   0x1   :  { %v1790_v0 = vld [vmem:[%s2842_s0 + $0x8] sm:$0xff]  ;;  %v1795_v1 = vld [vmem:[%s2842_s0] sm:$0xff]  ;;  %v1804_v2 = vld [vmem:[%s2842_s0 + $0x10] sm:$0xff]  ;;  %s1728_s13 = smov 113   ;;  %s1729_s16 = smov 127   ;;  %360 = vmatprep.mubr.f32.mxu0 %v1733_v4  ;;  %431 = vmatprep.mubr.f32.mxu1 %v1733_v4  ;;  %vm1486_vm10 = vcmask 1048064  }
   0x2   :  { %232 = vrot.lane.b32.xlu0 %v1790_v0, %s1726_s9  ;;  %230 = vrot.lane.b32.xlu1 %v1795_v1, %s1726_s9  ;;  %v1821_v3 = vld [vmem:[%s2842_s0 + $0x18] sm:$0xff]  ;;  %s1730_s0 = smov 1   ;;  %s1731_s17 = smov 15   ;;  %v1873_v6 = vand.u32 127, %v42_v5  ;;  %v1879_v9 = vld [vmem:[%s2843_s6 + $0x108] sm:$0xff] }
   0x3   :  { %s1732_s18 = smov 16   ;;  %s1734_s19 = smov 17   ;;  %v1886_v13 = vld [vmem:[%s2843_s6 + $0x100] sm:$0xff]  ;;  %v1895_v16 = vld [vmem:[%s2843_s6 + $0xe8] sm:$0xff]  ;;  %v1926_v31 = vld [vmem:[%s2843_s6 + $0x118] sm:$0xff] }
   0x4   :  { %vm238_vm0 = vcmp.lt.s32.totalorder %v1873_v6, 111  ;;  %vm212_vm1 = vcmp.lt.s32.totalorder %v1873_v6, 112  ;;  %v1901_v18 = vld [vmem:[%s2843_s6 + $0xe0] sm:$0xff]  ;;  %vm186_vm2 = vcmp.lt.s32.totalorder %v1873_v6, 113  ;;  %v1913_v25 = vld [vmem:[%s2843_s6 + $0xc8] sm:$0xff]  ;;  %v1931_v32 = vld [vmem:[%s2843_s6 + $0x110] sm:$0xff] }
   0x5   :  { %v1921_v30 = vld [vmem:[%s2843_s6 + $0xc0] sm:$0xff]  ;;  %vm160_vm3 = vcmp.lt.s32.totalorder %v1873_v6, 127  ;;  %v1946_v41 = vld [vmem:[%s2843_s6 + $0xa8] sm:$0xff]  ;;  %v1953_v45 = vld [vmem:[%s2843_s6 + $0xf0] sm:$0xff]  ;;  %vm121_vm4 = vcmp.lt.s32.totalorder %v1873_v6, 1  ;;  %vm95_vm5 = vcmp.lt.s32.totalorder %v1873_v6, 15 }
   0x6   :  { %234 = vrot.lane.b32.xlu0 %v1804_v2, %s1726_s9  ;;  %206 = vrot.lane.b32.xlu1 %v1790_v0, %s1727_s12  ;;  %v1959_v47 = vld [vmem:[%s2843_s6 + $0x88] sm:$0xff]  ;;  %v1964_v48 = vld [vmem:[%s2843_s6 + $0xf8] sm:$0xff]  ;;  %vm69_vm6 = vcmp.lt.s32.totalorder %v1873_v6, 16  ;;  %vm44_vm7 = vcmp.lt.s32.totalorder %v1873_v6, 17  ;;  %s1739_s22 = smov 64  }
   0x7   :  { %v1969_v49 = vld [vmem:[%s2843_s6 + $0xa0] sm:$0xff]  ;;  %v145_v56 = vmul.f32 %v1959_v47, %v1790_v0  ;;  %v1992_v61 = vld [vmem:[%s2843_s6 + $0xd0] sm:$0xff]  ;;  %v1997_v62 = vld [vmem:[%s2843_s6 + $0xd8] sm:$0xff] }
   0x8   :  { %v1974_v50 = vld [vmem:[%s2843_s6 + $0x80] sm:$0xff]  ;;  %v1723_v6 = vld [vmem:[%s2843_s6 + $0x8] sm:$0xff] }
   0x9   :  { %v144_v60 = vmul.f32 %v1974_v50, %v1795_v1 }
   0xa   :  { %208 = vrot.lane.b32.xlu0 %v1804_v2, %s1727_s12  ;;  %204 = vrot.lane.b32.xlu1 %v1795_v1, %s1727_s12 }
   0xe   :  { %180 = vrot.lane.b32.xlu0 %v1790_v0, %s1728_s13  ;;  %182 = vrot.lane.b32.xlu1 %v1804_v2, %s1728_s13 }
  0x12   :  { %236 = vrot.lane.b32.xlu0 %v1821_v3, %s1726_s9  ;;  %178 = vrot.lane.b32.xlu1 %v1795_v1, %s1728_s13 }
  0x16   :  { %154 = vrot.lane.b32.xlu0 %v1790_v0, %s1729_s16  ;;  %156 = vrot.lane.b32.xlu1 %v1804_v2, %s1729_s16 }
  0x1a   :  { %210 = vrot.lane.b32.xlu0 %v1821_v3, %s1727_s12  ;;  %152 = vrot.lane.b32.xlu1 %v1795_v1, %s1729_s16 }
  0x1e   :  { %184 = vrot.lane.b32.xlu0 %v1821_v3, %s1728_s13  ;;  %113 = vrot.lane.b32.xlu1 %v1795_v1, %s1730_s0 }
  0x22   :  { %115 = vrot.lane.b32.xlu0 %v1790_v0, %s1730_s0  ;;  %158 = vrot.lane.b32.xlu1 %v1821_v3, %s1729_s16 }
  0x26   :  { %119 = vrot.lane.b32.xlu0 %v1821_v3, %s1730_s0  ;;  %87 = vrot.lane.b32.xlu1 %v1795_v1, %s1731_s17 }
  0x2a   :  { %89 = vrot.lane.b32.xlu0 %v1790_v0, %s1731_s17  ;;  %93 = vrot.lane.b32.xlu1 %v1821_v3, %s1731_s17 }
  0x2e   :  { %61 = vrot.lane.b32.xlu0 %v1795_v1, %s1732_s18  ;;  %63 = vrot.lane.b32.xlu1 %v1790_v0, %s1732_s18 }
  0x32   :  { %117 = vrot.lane.b32.xlu0 %v1804_v2, %s1730_s0  ;;  %67 = vrot.lane.b32.xlu1 %v1821_v3, %s1732_s18 }
  0x36   :  { %34 = vrot.lane.b32.xlu0 %v1795_v1, %s1734_s19  ;;  %36 = vrot.lane.b32.xlu1 %v1790_v0, %s1734_s19 }
  0x3a   :  { %91 = vrot.lane.b32.xlu0 %v1804_v2, %s1731_s17  ;;  %40 = vrot.lane.b32.xlu1 %v1821_v3, %s1734_s19 }
  0x3e   :  { %65 = vrot.lane.b32.xlu0 %v1804_v2, %s1732_s18  ;;  %38 = vrot.lane.b32.xlu1 %v1804_v2, %s1734_s19 }
  0x74   :  { %v233_v7 = vpop.permute.xlu0 %232  ;;  %v231_v8 = vpop.permute.xlu1 %230 }
  0x75   :  { %v241_v12 = vsel %vm238_vm0, %v231_v8, %v233_v7 }
  0x76   :  { %v248_v17 = vmul.f32 %v1886_v13, %v241_v12  ;;  %v2019_v12 = vld [vmem:[%s2843_s6 + $0xb0] sm:$0xff] }
  0x78   :  { %v235_v10 = vpop.permute.xlu0 %234  ;;  %v207_v11 = vpop.permute.xlu1 %206 }
  0x79   :  { %v240_v14 = vsel %vm238_vm0, %v233_v7, %v235_v10 }
  0x7a   :  { %v249_v15 = vmul.f32 %v1879_v9, %v240_v14  ;;  %v2024_v14 = vld [vmem:[%s2843_s6 + $0x98] sm:$0xff] }
  0x7c   :  { %310 = vmatprep.subr.mxu0 %v249_v15  ;;  %v209_v19 = vpop.permute.xlu0 %208  ;;  %v205_v20 = vpop.permute.xlu1 %204 }
  0x7d   :  { %v214_v21 = vsel %vm212_vm1, %v207_v11, %v209_v19  ;;  %v215_v22 = vsel %vm212_vm1, %v205_v20, %v207_v11  ;;  %311 = vmatpush1.msra.mxu0 %v248_v17  ;;  %v2014_v11 = vld [vmem:[%s2843_s6 + $0xb8] sm:$0xff] }
  0x7e   :  { %v223_v23 = vmul.f32 %v1895_v16, %v214_v21  ;;  %v222_v24 = vmul.f32 %v1901_v18, %v215_v22 }
  0x80   :  { %v181_v26 = vpop.permute.xlu0 %180  ;;  %312 = vmatprep.subr.mxu0 %v223_v23  ;;  %v183_v27 = vpop.permute.xlu1 %182 }
  0x81   :  { %v188_v28 = vsel %vm186_vm2, %v181_v26, %v183_v27  ;;  %313 = vmatpush1.msra.mxu0 %v222_v24 }
  0x82   :  { %v197_v29 = vmul.f32 %v1913_v25, %v188_v28  ;;  %v2045_v28 = vld [vmem:[%s2843_s6 + $0x60] sm:$0xff] }
  0x84   :  { %v237_v33 = vpop.permute.xlu0 %236  ;;  %314 = vmatprep.subr.mxu0 %v197_v29  ;;  %v179_v34 = vpop.permute.xlu1 %178 }
  0x85   :  { %v239_v35 = vsel %vm238_vm0, %v235_v10, %v237_v33  ;;  %v189_v36 = vsel %vm186_vm2, %v179_v34, %v181_v26  ;;  %v242_v37 = vsel %vm238_vm0, %v237_v33, %v231_v8  ;;  %v2009_v10 = vld [vmem:[%s2843_s6 + $0x68] sm:$0xff] }
  0x86   :  { %v196_v38 = vmul.f32 %v1921_v30, %v189_v36  ;;  %v251_v39 = vmul.f32 %v1926_v31, %v242_v37  ;;  %v250_v40 = vmul.f32 %v1931_v32, %v239_v35 }
  0x88   :  { %v155_v42 = vpop.permute.xlu0 %154  ;;  %315 = vmatpush1.msra.mxu0 %v196_v38  ;;  %381 = vmatprep.subr.mxu1 %v251_v39  ;;  %v157_v43 = vpop.permute.xlu1 %156 }
  0x89   :  { %v162_v44 = vsel %vm160_vm3, %v155_v42, %v157_v43  ;;  %382 = vmatpush1.msra.mxu1 %v250_v40 }
  0x8a   :  { %v171_v46 = vmul.f32 %v1946_v41, %v162_v44  ;;  %v2073_v44 = vld [vmem:[%s2843_s6 + $0x28] sm:$0xff] }
  0x8c   :  { %v211_v51 = vpop.permute.xlu0 %210  ;;  %316 = vmatprep.subr.mxu0 %v171_v46  ;;  %v153_v52 = vpop.permute.xlu1 %152 }
  0x8d   :  { %v213_v53 = vsel %vm212_vm1, %v209_v19, %v211_v51  ;;  %v216_v54 = vsel %vm212_vm1, %v211_v51, %v205_v20  ;;  %v163_v55 = vsel %vm160_vm3, %v153_v52, %v155_v42  ;;  %v2029_v19 = vld [vmem:[%s2843_s6 + $0x90] sm:$0xff] }
  0x8e   :  { %v224_v57 = vmul.f32 %v1953_v45, %v213_v53  ;;  %v225_v58 = vmul.f32 %v1964_v48, %v216_v54  ;;  %v170_v59 = vmul.f32 %v1969_v49, %v163_v55  ;;  %v146_v29 = vmul.f32 %v2029_v19, %v1804_v2  ;;  %v2061_v2 = vld [vmem:[%s2843_s6 + $0x40] sm:$0xff]  ;;  %v2081_v54 = vld [vmem:[%s2843_s6 + $0x70] sm:$0xff]  ;;  %v2086_v55 = vld [vmem:[%s2843_s6 + $0x78] sm:$0xff] }
  0x90   :  { %v185_v63 = vpop.permute.xlu0 %184  ;;  %317 = vmatpush1.msra.mxu0 %v170_v59  ;;  %383 = vmatprep.subr.mxu1 %v225_v58  ;;  %v114_v0 = vpop.permute.xlu1 %113 }
  0x91   :  { %v187_v5 = vsel %vm186_vm2, %v183_v27, %v185_v63  ;;  %v190_v1 = vsel %vm186_vm2, %v185_v63, %v179_v34  ;;  %384 = vmatpush1.msra.mxu1 %v224_v57  ;;  %318 = vmatprep.subr.mxu0 %v145_v56  ;;  %v147_v27 = vmul.f32 %v2024_v14, %v1821_v3  ;;  %v2056_v3 = vld [vmem:[%s2843_s6 + $0x48] sm:$0xff]  ;;  %v2091_v56 = vld [vmem:[%s2843_s6 + $0x20] sm:$0xff] }
  0x92   :  { %v198_v7 = vmul.f32 %v1992_v61, %v187_v5  ;;  %v199_v8 = vmul.f32 %v1997_v62, %v190_v1  ;;  %319 = vmatpush1.msra.mxu0 %v144_v60 }
  0x94   :  { %v116_v15 = vpop.permute.xlu0 %115  ;;  %385 = vmatprep.subr.mxu1 %v199_v8  ;;  %v159_v17 = vpop.permute.xlu1 %158 }
  0x95   :  { %v124_v20 = vsel %vm121_vm4, %v114_v0, %v116_v15  ;;  %v161_v21 = vsel %vm160_vm3, %v157_v43, %v159_v17  ;;  %v164_v22 = vsel %vm160_vm3, %v159_v17, %v153_v52  ;;  %386 = vmatpush1.msra.mxu1 %v198_v7  ;;  %v2106_v7 = vld [vmem:[%s2843_s6 + $0x8] sm:$0xff] }
  0x96   :  { %v132_v23 = vmul.f32 %v2009_v10, %v124_v20  ;;  %v173_v24 = vmul.f32 %v2014_v11, %v164_v22  ;;  %v172_v26 = vmul.f32 %v2019_v12, %v161_v21  ;;  %v2114_v21 = vld [vmem:[%s2843_s6 + $0x50] sm:$0xff]  ;;  %v2119_v22 = vld [vmem:[%s2843_s6 + $0x58] sm:$0xff] }
  0x98   :  { %v120_v33 = vpop.permute.xlu0 %119  ;;  %387 = vmatprep.subr.mxu1 %v173_v24  ;;  %v88_v34 = vpop.permute.xlu1 %87  ;;  %320 = vmatprep.subr.mxu0 %v132_v23  ;;  %v2124_v23 = vld [vmem:[%s2843_s6] sm:$0xff] }
  0x99   :  { %v125_v35 = vsel %vm121_vm4, %v120_v33, %v114_v0  ;;  %388 = vmatpush1.msra.mxu1 %v172_v26 }
  0x9a   :  { %v131_v36 = vmul.f32 %v2045_v28, %v125_v35  ;;  %389 = vmatprep.subr.mxu1 %v147_v27 }
  0x9b   :  { %390 = vmatpush1.msra.mxu1 %v146_v29 }
  0x9c   :  { %v90_v37 = vpop.permute.xlu0 %89  ;;  %v94_v38 = vpop.permute.xlu1 %93  ;;  %321 = vmatpush1.msra.mxu0 %v131_v36 }
  0x9d   :  { %v98_v39 = vsel %vm95_vm5, %v88_v34, %v90_v37  ;;  %v99_v40 = vsel %vm95_vm5, %v94_v38, %v88_v34 }
  0x9e   :  { %v106_v42 = vmul.f32 %v2056_v3, %v98_v39  ;;  %v105_v43 = vmul.f32 %v2061_v2, %v99_v40  ;;  %v2138_v39 = vld [vmem:[%s2843_s6 + $0x30] sm:$0xff] }
  0xa0   :  { %v62_v46 = vpop.permute.xlu0 %61  ;;  %v64_v51 = vpop.permute.xlu1 %63  ;;  %322 = vmatprep.subr.mxu0 %v106_v42 }
  0xa1   :  { %v72_v52 = vsel %vm69_vm6, %v62_v46, %v64_v51  ;;  %323 = vmatpush1.msra.mxu0 %v105_v43 }
  0xa2   :  { %v80_v53 = vmul.f32 %v2073_v44, %v72_v52  ;;  %v2155_v52 = vld [vmem:[%s2843_s6 + $0x18] sm:$0xff] }
  0xa4   :  { %v118_v57 = vpop.permute.xlu0 %117  ;;  %v68_v58 = vpop.permute.xlu1 %67  ;;  %324 = vmatprep.subr.mxu0 %v80_v53 }
  0xa5   :  { %v122_v59 = vsel %vm121_vm4, %v118_v57, %v120_v33  ;;  %v123_v60 = vsel %vm121_vm4, %v116_v15, %v118_v57  ;;  %v73_v63 = vsel %vm69_vm6, %v68_v58, %v62_v46 }
  0xa6   :  { %v133_v0 = vmul.f32 %v2081_v54, %v123_v60  ;;  %v134_v5 = vmul.f32 %v2086_v55, %v122_v59  ;;  %v79_v1 = vmul.f32 %v2091_v56, %v73_v63 }
  0xa8   :  { %v35_v8 = vpop.permute.xlu0 %34  ;;  %391 = vmatprep.subr.mxu1 %v134_v5  ;;  %v37_v17 = vpop.permute.xlu1 %36  ;;  %325 = vmatpush1.msra.mxu0 %v79_v1 }
  0xa9   :  { %v47_v15 = vsel %vm44_vm7, %v35_v8, %v37_v17  ;;  %392 = vmatpush1.msra.mxu1 %v133_v0 }
  0xaa   :  { %v54_v20 = vmul.f32 %v2106_v7, %v47_v15 }
  0xac   :  { %v92_v24 = vpop.permute.xlu0 %91  ;;  %v41_v26 = vpop.permute.xlu1 %40  ;;  %326 = vmatprep.subr.mxu0 %v54_v20 }
  0xad   :  { %v96_v27 = vsel %vm95_vm5, %v92_v24, %v94_v38  ;;  %v97_v29 = vsel %vm95_vm5, %v90_v37, %v92_v24  ;;  %v48_v33 = vsel %vm44_vm7, %v41_v26, %v35_v8  ;;  %v2143_v38 = vld [vmem:[%s2843_s6 + $0x38] sm:$0xff]  ;;  %v33_v37 = vld [vmem:[%s2844_s1] sm:$0xff]  ;;  %v1735_v24 = vmov 0  }
  0xae   :  { %v107_v34 = vmul.f32 %v2114_v21, %v97_v29  ;;  %v108_v35 = vmul.f32 %v2119_v22, %v96_v27  ;;  %v53_v36 = vmul.f32 %v2124_v23, %v48_v33  ;;  %1710 = vset.pattern.permute.xlu0 %v1735_v24  ;;  %v1736_v27 = vmov 1  }
  0xaf   :  { %1711 = vset.pattern.permute.xlu1 %v1736_v27 }
  0xb0   :  { %v66_v40 = vpop.permute.xlu0 %65  ;;  %393 = vmatprep.subr.mxu1 %v108_v35  ;;  %v39_v42 = vpop.permute.xlu1 %38  ;;  %327 = vmatpush1.msra.mxu0 %v53_v36 }
  0xb1   :  { %v70_v43 = vsel %vm69_vm6, %v66_v40, %v68_v58  ;;  %v71_v46 = vsel %vm69_vm6, %v64_v51, %v66_v40  ;;  %v45_v53 = vsel %vm44_vm7, %v39_v42, %v41_v26  ;;  %394 = vmatpush1.msra.mxu1 %v107_v34  ;;  %v2164_v58 = vld [vmem:[%s2843_s6 + $0x10] sm:$0xff]  ;;  %v46_v51 = vsel %vm44_vm7, %v37_v17, %v39_v42  ;;  %v2177_v26 = vld [vmem:[%s2845_s4] sm:$0xff] }
  0xb2   :  { %v81_v57 = vmul.f32 %v2138_v39, %v71_v46  ;;  %v82_v59 = vmul.f32 %v2143_v38, %v70_v43  ;;  %1552 = vmatmul.mubr.msk.f32.vlgmr.msra.gmra.mxu0 %vm292_vm8, %v33_v37  ;;  %v56_v60 = vmul.f32 %v2155_v52, %v45_v53  ;;  %v55_v63 = vmul.f32 %v2164_v58, %v46_v51 }
  0xb3   :  { %793 = vmatprep.mubr.f32.mxu0 %v1733_v4 }
  0xb4   :  { %395 = vmatprep.subr.mxu1 %v82_v59 }
  0xb5   :  { %396 = vmatpush1.msra.mxu1 %v81_v57 }
  0xb6   :  { %397 = vmatprep.subr.mxu1 %v56_v60 }
  0xb7   :  { %398 = vmatpush1.msra.mxu1 %v55_v63 }
  0xb8   :  { %1553 = vmatmul.mubr.msk.f32.vlgmr.msra.gmra.mxu1 %vm292_vm8, %v33_v37 }
  0xb9   :  { %864 = vmatprep.mubr.f32.mxu1 %v1733_v4 }
 0x172   :  { %v362_v0 = vpop.f32.mrf.mxu0 }
 0x174   :  { %v364_v5 = vpop.f32.mrf.mxu0 }
 0x175   :  { %v438_v1 = vadd.f32 %v364_v5, %v362_v0 }
 0x178   :  { %v433_v8 = vpop.f32.mrf.mxu1 }
 0x179   :  { %v439_v17 = vadd.f32 %v438_v1, %v433_v8 }
 0x17a   :  { %v435_v15 = vpop.f32.mrf.mxu1 }
 0x17b   :  { %v440_v20 = vadd.f32 %v439_v17, %v435_v15 }
 0x17d   :  { %441 = vadd.xlane.f32.xlu0 %v440_v20 }
 0x193   :  { %466 = vperm.xlu0 %1710, %v2177_v26  }
 0x206   :  { %v442_v29 = vpop.xlane.xlu0 %441 }
 0x207   :  { %v443_v33 = vmul.f32 0.001953125, %v442_v29 }
 0x209   :  { %v444_v34 = vsub.f32 %v362_v0, %v443_v33  ;;  %v445_v35 = vsub.f32 %v364_v5, %v443_v33  ;;  %v446_v36 = vsub.f32 %v433_v8, %v443_v33  ;;  %v447_v37 = vsub.f32 %v435_v15, %v443_v33 }
 0x20b   :  { %v448_v40 = vmul.f32 %v444_v34, %v444_v34  ;;  %v449_v42 = vmul.f32 %v445_v35, %v445_v35  ;;  %v450_v43 = vmul.f32 %v446_v36, %v446_v36  ;;  %v451_v53 = vmul.f32 %v447_v37, %v447_v37 }
 0x20d   :  { %v452_v46 = vadd.f32 %v449_v42, %v448_v40 }
 0x20e   :  { %v467_v17 = vpop.permute.xlu0 %466 }
 0x20f   :  { %v453_v57 = vadd.f32 %v452_v46, %v450_v43 }
 0x211   :  { %v454_v59 = vadd.f32 %v453_v57, %v451_v53 }
 0x213   :  { %455 = vadd.xlane.f32.xlu1 %v454_v59 }
 0x224   :  { %474 = vperm.xlu1 %1711, %v2177_v26  }
 0x29c   :  { %v456_v51 = vpop.xlane.xlu1 %455 }
 0x29d   :  { %v457_v60 = vmul.f32 0.001953125, %v456_v51 }
 0x29f   :  { %v458_v63 = vadd.f32 1e-05, %v457_v60 }
 0x2a0   :  { %v475_v15 = vpop.permute.xlu1 %474 }
 0x2a1   :  { %1717 = vrsqrt.f32 %v458_v63 }
 0x2ae   :  { %v1718_v1 = vpop.eup %1717 }
 0x2af   :  { %v461_v0 = vmul.f32 %v1718_v1, %v445_v35  ;;  %v462_v5 = vmul.f32 %v1718_v1, %v446_v36  ;;  %v463_v8 = vmul.f32 %v1718_v1, %v447_v37  ;;  %v460_v20 = vmul.f32 %v1718_v1, %v444_v34 }
 0x2b1   :  { %v470_v24 = vmul.f32 %v467_v17, %v461_v0  ;;  %v471_v27 = vmul.f32 %v467_v17, %v462_v5  ;;  %v472_v29 = vmul.f32 %v467_v17, %v463_v8  ;;  %v469_v40 = vmul.f32 %v467_v17, %v460_v20 }
 0x2b3   :  { %v478_v33 = vadd.f32 %v475_v15, %v470_v24  ;;  %v479_v42 = vadd.f32 %v475_v15, %v471_v27  ;;  %v480_v43 = vadd.f32 %v475_v15, %v472_v29  ;;  %v477_v35 = vadd.f32 %v475_v15, %v469_v40 }
 0x2b5   :  { %v2181_v46 = vmax.f32 %v478_v33, 0.0  ;;  %v2187_v36 = vmax.f32 %v479_v42, 0.0  ;;  %v2189_v37 = vmax.f32 %v480_v43, 0.0  ;;  %v2195_v34 = vmax.f32 %v477_v35, 0.0 }
 0x2b7   :  { %620 = vrot.lane.b32.xlu0 %v2181_v46, %s1728_s13  ;;  %668 = vrot.lane.b32.xlu1 %v2181_v46, %s1726_s9 }
 0x2bb   :  { %672 = vrot.lane.b32.xlu0 %v2189_v37, %s1726_s9  ;;  %670 = vrot.lane.b32.xlu1 %v2187_v36, %s1726_s9 }
 0x2bf   :  { %596 = vrot.lane.b32.xlu0 %v2181_v46, %s1729_s16  ;;  %666 = vrot.lane.b32.xlu1 %v2195_v34, %s1726_s9 }
 0x2c3   :  { %648 = vrot.lane.b32.xlu0 %v2189_v37, %s1727_s12  ;;  %644 = vrot.lane.b32.xlu1 %v2181_v46, %s1727_s12 }
 0x2c7   :  { %624 = vrot.lane.b32.xlu0 %v2189_v37, %s1728_s13  ;;  %646 = vrot.lane.b32.xlu1 %v2187_v36, %s1727_s12 }
 0x2cb   :  { %560 = vrot.lane.b32.xlu0 %v2181_v46, %s1730_s0  ;;  %642 = vrot.lane.b32.xlu1 %v2195_v34, %s1727_s12 }
 0x2cf   :  { %564 = vrot.lane.b32.xlu0 %v2189_v37, %s1730_s0  ;;  %622 = vrot.lane.b32.xlu1 %v2187_v36, %s1728_s13 }
 0x2d3   :  { %536 = vrot.lane.b32.xlu0 %v2181_v46, %s1731_s17  ;;  %618 = vrot.lane.b32.xlu1 %v2195_v34, %s1728_s13 }
 0x2d7   :  { %510 = vrot.lane.b32.xlu0 %v2195_v34, %s1732_s18  ;;  %598 = vrot.lane.b32.xlu1 %v2187_v36, %s1729_s16 }
 0x2db   :  { %562 = vrot.lane.b32.xlu0 %v2187_v36, %s1730_s0  ;;  %594 = vrot.lane.b32.xlu1 %v2195_v34, %s1729_s16 }
 0x2df   :  { %486 = vrot.lane.b32.xlu0 %v2195_v34, %s1734_s19  ;;  %558 = vrot.lane.b32.xlu1 %v2195_v34, %s1730_s0 }
 0x2e3   :  { %538 = vrot.lane.b32.xlu0 %v2187_v36, %s1731_s17  ;;  %600 = vrot.lane.b32.xlu1 %v2189_v37, %s1729_s16 }
 0x2e7   :  { %514 = vrot.lane.b32.xlu0 %v2187_v36, %s1732_s18  ;;  %534 = vrot.lane.b32.xlu1 %v2195_v34, %s1731_s17 }
 0x2eb   :  { %540 = vrot.lane.b32.xlu1 %v2189_v37, %s1731_s17 }
 0x2ef   :  { %512 = vrot.lane.b32.xlu1 %v2181_v46, %s1732_s18 }
 0x2f3   :  { %516 = vrot.lane.b32.xlu1 %v2189_v37, %s1732_s18 }
 0x2f7   :  { %488 = vrot.lane.b32.xlu1 %v2181_v46, %s1734_s19 }
 0x2fb   :  { %492 = vrot.lane.b32.xlu1 %v2189_v37, %s1734_s19 }
 0x2ff   :  { %490 = vrot.lane.b32.xlu1 %v2187_v36, %s1734_s19 }
 0x329   :  { %v621_v53 = vpop.permute.xlu0 %620  ;;  %v669_v57 = vpop.permute.xlu1 %668 }
 0x32d   :  { %v673_v59 = vpop.permute.xlu0 %672  ;;  %v671_v51 = vpop.permute.xlu1 %670 }
 0x32e   :  { %v675_v60 = vsel %vm238_vm0, %v669_v57, %v671_v51  ;;  %v674_v1 = vsel %vm238_vm0, %v671_v51, %v673_v59 }
 0x32f   :  { %v683_v63 = vmul.f32 %v1879_v9, %v675_v60  ;;  %v684_v24 = vmul.f32 %v1931_v32, %v674_v1 }
 0x331   :  { %v597_v17 = vpop.permute.xlu0 %596  ;;  %743 = vmatprep.subr.mxu0 %v683_v63  ;;  %v667_v0 = vpop.permute.xlu1 %666 }
 0x332   :  { %v676_v5 = vsel %vm238_vm0, %v667_v0, %v669_v57  ;;  %v677_v8 = vsel %vm238_vm0, %v673_v59, %v667_v0 }
 0x333   :  { %v682_v15 = vmul.f32 %v1886_v13, %v676_v5  ;;  %v685_v20 = vmul.f32 %v1926_v31, %v677_v8 }
 0x335   :  { %v649_v27 = vpop.permute.xlu0 %648  ;;  %744 = vmatpush1.msra.mxu0 %v682_v15  ;;  %814 = vmatprep.subr.mxu1 %v685_v20  ;;  %v645_v9 = vpop.permute.xlu1 %644 }
 0x336   :  { %815 = vmatpush1.msra.mxu1 %v684_v24 }
 0x339   :  { %v625_v29 = vpop.permute.xlu0 %624  ;;  %v647_v33 = vpop.permute.xlu1 %646 }
 0x33a   :  { %v651_v40 = vsel %vm212_vm1, %v645_v9, %v647_v33  ;;  %v650_v43 = vsel %vm212_vm1, %v647_v33, %v649_v27 }
 0x33b   :  { %v659_v42 = vmul.f32 %v1895_v16, %v651_v40  ;;  %v660_v63 = vmul.f32 %v1953_v45, %v650_v43 }
 0x33d   :  { %v561_v13 = vpop.permute.xlu0 %560  ;;  %745 = vmatprep.subr.mxu0 %v659_v42  ;;  %v643_v35 = vpop.permute.xlu1 %642 }
 0x33e   :  { %v652_v57 = vsel %vm212_vm1, %v643_v35, %v645_v9  ;;  %v653_v59 = vsel %vm212_vm1, %v649_v27, %v643_v35 }
 0x33f   :  { %v658_v51 = vmul.f32 %v1901_v18, %v652_v57  ;;  %v661_v60 = vmul.f32 %v1964_v48, %v653_v59  ;;  %v587_v57 = vmul.f32 %v1959_v47, %v2181_v46 }
 0x341   :  { %v565_v1 = vpop.permute.xlu0 %564  ;;  %746 = vmatpush1.msra.mxu0 %v658_v51  ;;  %816 = vmatprep.subr.mxu1 %v661_v60  ;;  %v623_v16 = vpop.permute.xlu1 %622  ;;  %v586_v51 = vmul.f32 %v1974_v50, %v2195_v34 }
 0x342   :  { %v627_v0 = vsel %vm186_vm2, %v621_v53, %v623_v16  ;;  %817 = vmatpush1.msra.mxu1 %v660_v63  ;;  %v626_v8 = vsel %vm186_vm2, %v623_v16, %v625_v29 }
 0x343   :  { %v635_v5 = vmul.f32 %v1913_v25, %v627_v0  ;;  %v636_v33 = vmul.f32 %v1992_v61, %v626_v8 }
 0x345   :  { %v537_v15 = vpop.permute.xlu0 %536  ;;  %747 = vmatprep.subr.mxu0 %v635_v5  ;;  %v619_v18 = vpop.permute.xlu1 %618  ;;  %v589_v5 = vmul.f32 %v2024_v14, %v2189_v37 }
 0x346   :  { %v628_v20 = vsel %vm186_vm2, %v619_v18, %v621_v53  ;;  %v629_v24 = vsel %vm186_vm2, %v625_v29, %v619_v18 }
 0x347   :  { %v634_v27 = vmul.f32 %v1921_v30, %v628_v20  ;;  %v637_v9 = vmul.f32 %v1997_v62, %v629_v24  ;;  %v588_v20 = vmul.f32 %v2029_v19, %v2187_v36 }
 0x349   :  { %v2289_v40 = vpop.permute.xlu0 %510  ;;  %748 = vmatpush1.msra.mxu0 %v634_v27  ;;  %818 = vmatprep.subr.mxu1 %v637_v9  ;;  %v599_v25 = vpop.permute.xlu1 %598 }
 0x34a   :  { %v603_v42 = vsel %vm160_vm3, %v597_v17, %v599_v25  ;;  %819 = vmatpush1.msra.mxu1 %v636_v33 }
 0x34b   :  { %v611_v53 = vmul.f32 %v1946_v41, %v603_v42 }
 0x34d   :  { %749 = vmatprep.subr.mxu0 %v611_v53  ;;  %v595_v43 = vpop.permute.xlu1 %594  ;;  %v563_v29 = vpop.permute.xlu0 %562 }
 0x34e   :  { %v604_v30 = vsel %vm160_vm3, %v595_v43, %v597_v17 }
 0x34f   :  { %v610_v35 = vmul.f32 %v1969_v49, %v604_v30 }
 0x351   :  { %750 = vmatpush1.msra.mxu0 %v610_v35  ;;  %v559_v59 = vpop.permute.xlu1 %558  ;;  %v487_v49 = vpop.permute.xlu0 %486 }
 0x352   :  { %v568_v60 = vsel %vm121_vm4, %v559_v59, %v561_v13  ;;  %v569_v41 = vsel %vm121_vm4, %v565_v1, %v559_v59  ;;  %751 = vmatprep.subr.mxu0 %v587_v57 }
 0x353   :  { %v574_v63 = vmul.f32 %v2045_v28, %v569_v41  ;;  %v575_v17 = vmul.f32 %v2009_v10, %v568_v60  ;;  %752 = vmatpush1.msra.mxu0 %v586_v51  ;;  %v566_v28 = vsel %vm121_vm4, %v563_v29, %v565_v1  ;;  %v567_v10 = vsel %vm121_vm4, %v561_v13, %v563_v29 }
 0x354   :  { %v577_v24 = vmul.f32 %v2086_v55, %v566_v28  ;;  %v576_v13 = vmul.f32 %v2081_v54, %v567_v10 }
 0x355   :  { %v601_v16 = vpop.permute.xlu1 %600  ;;  %753 = vmatprep.subr.mxu0 %v575_v17  ;;  %v539_v8 = vpop.permute.xlu0 %538  ;;  %v485_v17 = vld [vmem:[%s2846_s2] sm:$0xff] }
 0x356   :  { %v602_v47 = vsel %vm160_vm3, %v599_v25, %v601_v16  ;;  %v605_v50 = vsel %vm160_vm3, %v601_v16, %v595_v43  ;;  %754 = vmatpush1.msra.mxu0 %v574_v63  ;;  %v543_v27 = vsel %vm95_vm5, %v537_v15, %v539_v8 }
 0x357   :  { %v612_v46 = vmul.f32 %v2019_v12, %v602_v47  ;;  %v613_v34 = vmul.f32 %v2014_v11, %v605_v50  ;;  %v552_v25 = vmul.f32 %v2114_v21, %v543_v27 }
 0x359   :  { %820 = vmatprep.subr.mxu1 %v613_v34  ;;  %v535_v0 = vpop.permute.xlu1 %534  ;;  %v515_v43 = vpop.permute.xlu0 %514 }
 0x35a   :  { %v544_v18 = vsel %vm95_vm5, %v535_v0, %v537_v15  ;;  %821 = vmatpush1.msra.mxu1 %v612_v46 }
 0x35b   :  { %v551_v1 = vmul.f32 %v2056_v3, %v544_v18  ;;  %822 = vmatprep.subr.mxu1 %v589_v5  ;;  %v1738_v18 = vmov 3  }
 0x35c   :  { %823 = vmatpush1.msra.mxu1 %v588_v20  ;;  %1713 = vset.pattern.permute.xlu1 %v1738_v18 }
 0x35d   :  { %824 = vmatprep.subr.mxu1 %v577_v24  ;;  %v541_v37 = vpop.permute.xlu1 %540  ;;  %755 = vmatprep.subr.mxu0 %v551_v1 }
 0x35e   :  { %v542_v9 = vsel %vm95_vm5, %v539_v8, %v541_v37  ;;  %v545_v36 = vsel %vm95_vm5, %v541_v37, %v535_v0  ;;  %825 = vmatpush1.msra.mxu1 %v576_v13  ;;  %v1737_v8 = vmov 2  }
 0x35f   :  { %v550_v33 = vmul.f32 %v2061_v2, %v545_v36  ;;  %v553_v3 = vmul.f32 %v2119_v22, %v542_v9  ;;  %1712 = vset.pattern.permute.xlu0 %v1737_v8 }
 0x361   :  { %826 = vmatprep.subr.mxu1 %v553_v3  ;;  %v513_v42 = vpop.permute.xlu1 %512  ;;  %756 = vmatpush1.msra.mxu0 %v550_v33 }
 0x362   :  { %v520_v15 = vsel %vm69_vm6, %v2289_v40, %v513_v42  ;;  %827 = vmatpush1.msra.mxu1 %v552_v25  ;;  %v519_v29 = vsel %vm69_vm6, %v513_v42, %v515_v43 }
 0x363   :  { %v527_v53 = vmul.f32 %v2073_v44, %v520_v15  ;;  %v528_v51 = vmul.f32 %v2138_v39, %v519_v29 }
 0x365   :  { %v517_v30 = vpop.permute.xlu1 %516  ;;  %757 = vmatprep.subr.mxu0 %v527_v53 }
 0x366   :  { %v518_v2 = vsel %vm69_vm6, %v515_v43, %v517_v30  ;;  %v521_v35 = vsel %vm69_vm6, %v517_v30, %v2289_v40 }
 0x367   :  { %v526_v57 = vmul.f32 %v2091_v56, %v521_v35  ;;  %v529_v59 = vmul.f32 %v2143_v38, %v518_v2 }
 0x369   :  { %828 = vmatprep.subr.mxu1 %v529_v59  ;;  %v489_v44 = vpop.permute.xlu1 %488  ;;  %758 = vmatpush1.msra.mxu0 %v526_v57 }
 0x36a   :  { %v496_v60 = vsel %vm44_vm7, %v487_v49, %v489_v44  ;;  %829 = vmatpush1.msra.mxu1 %v528_v51 }
 0x36b   :  { %v503_v41 = vmul.f32 %v496_v60, %v2106_v7 }
 0x36d   :  { %v493_v63 = vpop.permute.xlu1 %492  ;;  %759 = vmatprep.subr.mxu0 %v503_v41 }
 0x36e   :  { %v497_v40 = vsel %vm44_vm7, %v493_v63, %v487_v49 }
 0x36f   :  { %v502_v56 = vmul.f32 %v497_v40, %v2124_v23 }
 0x371   :  { %v491_v16 = vpop.permute.xlu1 %490  ;;  %760 = vmatpush1.msra.mxu0 %v502_v56 }
 0x372   :  { %v494_v47 = vsel %vm44_vm7, %v491_v16, %v493_v63  ;;  %v495_v50 = vsel %vm44_vm7, %v489_v44, %v491_v16  ;;  %1586 = vmatmul.mubr.msk.f32.vlgmr.msra.gmra.mxu0 %vm292_vm8, %v485_v17 }
 0x373   :  { %v504_v7 = vmul.f32 %v495_v50, %v2164_v58  ;;  %v505_v49 = vmul.f32 %v494_v47, %v2155_v52  ;;  %1230 = vmatprep.mubr.f32.mxu0 %v1733_v4 }
 0x375   :  { %830 = vmatprep.subr.mxu1 %v505_v49 }
 0x376   :  { %831 = vmatpush1.msra.mxu1 %v504_v7 }
 0x377   :  { %1587 = vmatmul.mubr.msk.f32.vlgmr.msra.gmra.mxu1 %vm292_vm8, %v485_v17 }
 0x378   :  { %1301 = vmatprep.mubr.f32.mxu1 %v1733_v4 }
 0x432   :  { %v795_v23 = vpop.f32.mrf.mxu0 }
 0x434   :  { %v797_v46 = vpop.f32.mrf.mxu0 }
 0x435   :  { %v871_v34 = vadd.f32 %v797_v46, %v795_v23 }
 0x437   :  { %v866_v28 = vpop.f32.mrf.mxu1 }
 0x438   :  { %v872_v10 = vadd.f32 %v871_v34, %v866_v28 }
 0x439   :  { %v868_v0 = vpop.f32.mrf.mxu1 }
 0x43a   :  { %v873_v5 = vadd.f32 %v872_v10, %v868_v0 }
 0x43c   :  { %874 = vadd.xlane.f32.xlu0 %v873_v5 }
 0x452   :  { %898 = vperm.xlu0 %1712, %v2177_v26  }
 0x4c5   :  { %v875_v20 = vpop.xlane.xlu0 %874 }
 0x4c6   :  { %v876_v24 = vmul.f32 0.001953125, %v875_v20 }
 0x4c8   :  { %v877_v1 = vsub.f32 %v795_v23, %v876_v24  ;;  %v878_v13 = vsub.f32 %v797_v46, %v876_v24  ;;  %v879_v27 = vsub.f32 %v866_v28, %v876_v24  ;;  %v880_v4 = vsub.f32 %v868_v0, %v876_v24 }
 0x4ca   :  { %v881_v37 = vmul.f32 %v877_v1, %v877_v1  ;;  %v882_v9 = vmul.f32 %v878_v13, %v878_v13  ;;  %v883_v36 = vmul.f32 %v879_v27, %v879_v27  ;;  %v884_v3 = vmul.f32 %v880_v4, %v880_v4 }
 0x4cc   :  { %v885_v33 = vadd.f32 %v882_v9, %v881_v37 }
 0x4cd   :  { %v899_v30 = vpop.permute.xlu0 %898 }
 0x4ce   :  { %v886_v25 = vadd.f32 %v885_v33, %v883_v36 }
 0x4d0   :  { %v887_v42 = vadd.f32 %v886_v25, %v884_v3 }
 0x4d2   :  { %888 = vadd.xlane.f32.xlu1 %v887_v42 }
 0x4e3   :  { %906 = vperm.xlu1 %1713, %v2177_v26  }
 0x55b   :  { %v889_v15 = vpop.xlane.xlu1 %888 }
 0x55c   :  { %v890_v53 = vmul.f32 0.001953125, %v889_v15 }
 0x55e   :  { %v891_v43 = vadd.f32 1e-05, %v890_v53 }
 0x55f   :  { %v907_v51 = vpop.permute.xlu1 %906 }
 0x560   :  { %1719 = vrsqrt.f32 %v891_v43 }
 0x56d   :  { %v1720_v29 = vpop.eup %1719 }
 0x56e   :  { %v893_v2 = vmul.f32 %v1720_v29, %v877_v1  ;;  %v894_v35 = vmul.f32 %v1720_v29, %v878_v13  ;;  %v895_v57 = vmul.f32 %v1720_v29, %v879_v27  ;;  %v896_v59 = vmul.f32 %v1720_v29, %v880_v4 }
 0x570   :  { %v901_v44 = vmul.f32 %v899_v30, %v893_v2  ;;  %v902_v60 = vmul.f32 %v899_v30, %v894_v35  ;;  %v903_v41 = vmul.f32 %v899_v30, %v895_v57  ;;  %v904_v63 = vmul.f32 %v899_v30, %v896_v59 }
 0x572   :  { %v909_v40 = vadd.f32 %v907_v51, %v901_v44  ;;  %v910_v56 = vadd.f32 %v907_v51, %v902_v60  ;;  %v911_v17 = vadd.f32 %v907_v51, %v903_v41  ;;  %v912_v16 = vadd.f32 %v907_v51, %v904_v63 }
 0x574   :  { %v2370_v26 = vmax.f32 %v909_v40, 0.0  ;;  %v2372_v47 = vmax.f32 %v910_v56, 0.0  ;;  %v2374_v50 = vmax.f32 %v911_v17, 0.0  ;;  %v2376_v7 = vmax.f32 %v912_v16, 0.0 }
 0x576   :  { %917 = vst [vmem:[%s2847_s7] sm:$0xff] %v2370_v26  ;;  %918 = vst [vmem:[%s2847_s7 + $0x8] sm:$0xff] %v2372_v47  ;;  %1083 = vrot.lane.b32.xlu0 %v2374_v50, %s1727_s12  ;;  %1103 = vrot.lane.b32.xlu1 %v2370_v26, %s1726_s9  ;;  %v1025_v35 = vmul.f32 %v2029_v19, %v2374_v50 }
 0x577   :  { %1588 = vst [vmem:[%s2847_s7 + $0x10] sm:$0xff] %v2374_v50  ;;  %1589 = vst [vmem:[%s2847_s7 + $0x18] sm:$0xff] %v2376_v7 }
 0x57a   :  { %1061 = vrot.lane.b32.xlu0 %v2376_v7, %s1728_s13  ;;  %1109 = vrot.lane.b32.xlu1 %v2376_v7, %s1726_s9 }
 0x57e   :  { %1031 = vrot.lane.b32.xlu0 %v2370_v26, %s1729_s16  ;;  %1107 = vrot.lane.b32.xlu1 %v2374_v50, %s1726_s9 }
 0x582   :  { %1035 = vrot.lane.b32.xlu0 %v2374_v50, %s1729_s16  ;;  %1079 = vrot.lane.b32.xlu1 %v2370_v26, %s1727_s12 }
 0x586   :  { %1001 = vrot.lane.b32.xlu0 %v2376_v7, %s1730_s0  ;;  %1085 = vrot.lane.b32.xlu1 %v2376_v7, %s1727_s12 }
 0x58a   :  { %975 = vrot.lane.b32.xlu0 %v2374_v50, %s1731_s17  ;;  %1055 = vrot.lane.b32.xlu1 %v2370_v26, %s1728_s13 }
 0x58e   :  { %973 = vrot.lane.b32.xlu0 %v2372_v47, %s1731_s17  ;;  %1059 = vrot.lane.b32.xlu1 %v2374_v50, %s1728_s13 }
 0x592   :  { %953 = vrot.lane.b32.xlu0 %v2376_v7, %s1732_s18  ;;  %1037 = vrot.lane.b32.xlu1 %v2376_v7, %s1729_s16 }
 0x596   :  { %927 = vrot.lane.b32.xlu0 %v2374_v50, %s1734_s19  ;;  %999 = vrot.lane.b32.xlu1 %v2374_v50, %s1730_s0 }
 0x59a   :  { %925 = vrot.lane.b32.xlu0 %v2372_v47, %s1734_s19  ;;  %997 = vrot.lane.b32.xlu1 %v2372_v47, %s1730_s0 }
 0x59e   :  { %1081 = vrot.lane.b32.xlu0 %v2372_v47, %s1727_s12  ;;  %977 = vrot.lane.b32.xlu1 %v2376_v7, %s1731_s17 }
 0x5a2   :  { %1033 = vrot.lane.b32.xlu0 %v2372_v47, %s1729_s16  ;;  %951 = vrot.lane.b32.xlu1 %v2374_v50, %s1732_s18 }
 0x5a6   :  { %971 = vrot.lane.b32.xlu0 %v2370_v26, %s1731_s17  ;;  %949 = vrot.lane.b32.xlu1 %v2372_v47, %s1732_s18 }
 0x5aa   :  { %923 = vrot.lane.b32.xlu0 %v2370_v26, %s1734_s19  ;;  %929 = vrot.lane.b32.xlu1 %v2376_v7, %s1734_s19 }
 0x5ae   :  { %1105 = vrot.lane.b32.xlu1 %v2372_v47, %s1726_s9 }
 0x5b2   :  { %1057 = vrot.lane.b32.xlu1 %v2372_v47, %s1728_s13 }
 0x5b6   :  { %995 = vrot.lane.b32.xlu1 %v2370_v26, %s1730_s0 }
 0x5ba   :  { %947 = vrot.lane.b32.xlu1 %v2370_v26, %s1732_s18 }
 0x5e8   :  { %v2458_v49 = vpop.permute.xlu0 %1083  ;;  %v2460_v23 = vpop.permute.xlu1 %1103 }
 0x5ec   :  { %v1062_v46 = vpop.permute.xlu0 %1061  ;;  %v1110_v34 = vpop.permute.xlu1 %1109 }
 0x5ed   :  { %v1114_v28 = vsel %vm238_vm0, %v1110_v34, %v2460_v23 }
 0x5ee   :  { %v1122_v10 = vmul.f32 %v1926_v31, %v1114_v28  ;;  %v2567_v28 = vld [vmem:[%s2848_s3] sm:$0xff] }
 0x5f0   :  { %v2466_v0 = vpop.permute.xlu0 %1031  ;;  %1251 = vmatprep.subr.mxu1 %v1122_v10  ;;  %v2468_v5 = vpop.permute.xlu1 %1107  ;;  %v2572_v10 = vld [vmem:[%s2849_s5 + $0xf8] sm:$0xff] }
 0x5f1   :  { %v1111_v8 = vsel %vm238_vm0, %v2468_v5, %v1110_v34 }
 0x5f2   :  { %v1121_v18 = vmul.f32 %v1931_v32, %v1111_v8 }
 0x5f4   :  { %v2474_v20 = vpop.permute.xlu0 %1035  ;;  %1252 = vmatpush1.msra.mxu1 %v1121_v18  ;;  %v2476_v24 = vpop.permute.xlu1 %1079  ;;  %v1614_v18 = vld [vmem:[%s2843_s6 + $0xe0] sm:$0xff] }
 0x5f8   :  { %v2478_v1 = vpop.permute.xlu0 %1001  ;;  %v1086_v13 = vpop.permute.xlu1 %1085 }
 0x5f9   :  { %v1087_v31 = vsel %vm212_vm1, %v2458_v49, %v1086_v13  ;;  %v1090_v27 = vsel %vm212_vm1, %v1086_v13, %v2476_v24  ;;  %v1615_v13 = vld [vmem:[%s2843_s6 + $0xe8] sm:$0xff] }
 0x5fa   :  { %v1097_v4 = vmul.f32 %v1953_v45, %v1087_v31  ;;  %v1098_v32 = vmul.f32 %v1964_v48, %v1090_v27 }
 0x5fc   :  { %v976_v37 = vpop.permute.xlu0 %975  ;;  %1253 = vmatprep.subr.mxu1 %v1098_v32  ;;  %v2488_v9 = vpop.permute.xlu1 %1055 }
 0x5fd   :  { %v1066_v36 = vsel %vm186_vm2, %v1062_v46, %v2488_v9  ;;  %1254 = vmatpush1.msra.mxu1 %v1097_v4 }
 0x5fe   :  { %v1074_v33 = vmul.f32 %v1997_v62, %v1066_v36 }
 0x600   :  { %1255 = vmatprep.subr.mxu1 %v1074_v33  ;;  %v2494_v3 = vpop.permute.xlu1 %1059  ;;  %v2499_v25 = vpop.permute.xlu0 %973  ;;  %v2620_v33 = vld [vmem:[%s2849_s5 + $0xe8] sm:$0xff] }
 0x601   :  { %v1063_v45 = vsel %vm186_vm2, %v2494_v3, %v1062_v46  ;;  %v980_v51 = vsel %vm95_vm5, %v2499_v25, %v976_v37  ;;  %v1618_v46 = vld [vmem:[%s2843_s6 + $0x100] sm:$0xff] }
 0x602   :  { %v1073_v48 = vmul.f32 %v1992_v61, %v1063_v45  ;;  %v1026_v61 = vmul.f32 %v2024_v14, %v2376_v7  ;;  %v989_v60 = vmul.f32 %v2114_v21, %v980_v51  ;;  %v1602_v51 = vld [vmem:[%s2843_s6 + $0x80] sm:$0xff] }
 0x604   :  { %1256 = vmatpush1.msra.mxu1 %v1073_v48  ;;  %v1038_v42 = vpop.permute.xlu1 %1037  ;;  %v2510_v29 = vpop.permute.xlu0 %953 }
 0x605   :  { %v1039_v15 = vsel %vm160_vm3, %v2474_v20, %v1038_v42  ;;  %v1042_v62 = vsel %vm160_vm3, %v1038_v42, %v2466_v0 }
 0x606   :  { %v1049_v53 = vmul.f32 %v2019_v12, %v1039_v15  ;;  %v1050_v43 = vmul.f32 %v2014_v11, %v1042_v62  ;;  %v2626_v15 = vld [vmem:[%s2849_s5 + $0x68] sm:$0xff] }
 0x607   :  { %v1607_v62 = vld [vmem:[%s2843_s6 + $0xa8] sm:$0xff] }
 0x608   :  { %1257 = vmatprep.subr.mxu1 %v1050_v43  ;;  %v1000_v30 = vpop.permute.xlu1 %999  ;;  %v928_v14 = vpop.permute.xlu0 %927 }
 0x609   :  { %v1003_v2 = vsel %vm121_vm4, %v1000_v30, %v2478_v1  ;;  %1258 = vmatpush1.msra.mxu1 %v1049_v53 }
 0x60a   :  { %v1014_v57 = vmul.f32 %v2086_v55, %v1003_v2  ;;  %1259 = vmatprep.subr.mxu1 %v1026_v61  ;;  %v2644_v61 = vld [vmem:[%s2849_s5 + $0xe0] sm:$0xff] }
 0x60b   :  { %1260 = vmatpush1.msra.mxu1 %v1025_v35 }
 0x60c   :  { %1261 = vmatprep.subr.mxu1 %v1014_v57  ;;  %v2520_v11 = vpop.permute.xlu1 %997  ;;  %v2536_v41 = vpop.permute.xlu0 %925 }
 0x60d   :  { %v1004_v12 = vsel %vm121_vm4, %v2520_v11, %v1000_v30  ;;  %v932_v16 = vsel %vm44_vm7, %v2536_v41, %v928_v14 }
 0x60e   :  { %v1013_v59 = vmul.f32 %v2081_v54, %v1004_v12  ;;  %v941_v34 = vmul.f32 %v932_v16, %v2164_v58  ;;  %v2577_v58 = vld [vmem:[%s2849_s5 + $0x78] sm:$0xff]  ;;  %v1603_v12 = vld [vmem:[%s2843_s6 + $0x88] sm:$0xff] }
 0x610   :  { %1262 = vmatpush1.msra.mxu1 %v1013_v59  ;;  %v2529_v19 = vpop.permute.xlu1 %977  ;;  %v1082_v17 = vpop.permute.xlu0 %1081 }
 0x611   :  { %v979_v55 = vsel %vm95_vm5, %v976_v37, %v2529_v19  ;;  %v1088_v31 = vsel %vm212_vm1, %v1082_v17, %v2458_v49  ;;  %v1089_v27 = vsel %vm212_vm1, %v2476_v24, %v1082_v17  ;;  %v2600_v37 = vld [vmem:[%s2849_s5 + $0xf0] sm:$0xff]  ;;  %v1611_v24 = vld [vmem:[%s2843_s6 + $0xc8] sm:$0xff]  ;;  %v1024_v17 = vmul.f32 %v1603_v12, %v2372_v47 }
 0x612   :  { %v990_v44 = vmul.f32 %v2119_v22, %v979_v55  ;;  %v1095_v45 = vmul.f32 %v1614_v18, %v1089_v27  ;;  %v1096_v48 = vmul.f32 %v1615_v13, %v1088_v31  ;;  %v2674_v55 = vld [vmem:[%s2849_s5 + $0x58] sm:$0xff]  ;;  %v2712_v47 = vld [vmem:[%s2849_s5 + $0xc8] sm:$0xff]  ;;  %v1590_v13 = vld [vmem:[%s2843_s6 + $0x20] sm:$0xff] }
 0x614   :  { %1263 = vmatprep.subr.mxu1 %v990_v44  ;;  %v952_v63 = vpop.permute.xlu1 %951 }
 0x615   :  { %v955_v54 = vsel %vm69_vm6, %v952_v63, %v2510_v29  ;;  %1264 = vmatpush1.msra.mxu1 %v989_v60  ;;  %v1599_v60 = vld [vmem:[%s2843_s6 + $0x68] sm:$0xff] }
 0x616   :  { %v966_v40 = vmul.f32 %v2143_v38, %v955_v54  ;;  %v2686_v54 = vld [vmem:[%s2849_s5 + $0xd0] sm:$0xff] }
 0x618   :  { %1265 = vmatprep.subr.mxu1 %v966_v40  ;;  %v2542_v56 = vpop.permute.xlu1 %949  ;;  %v1598_v40 = vld [vmem:[%s2843_s6 + $0x60] sm:$0xff] }
 0x619   :  { %v956_v22 = vsel %vm69_vm6, %v2542_v56, %v952_v63 }
 0x61a   :  { %v965_v21 = vmul.f32 %v2138_v39, %v956_v22  ;;  %v1619_v39 = vld [vmem:[%s2843_s6 + $0x108] sm:$0xff] }
 0x61c   :  { %1266 = vmatpush1.msra.mxu1 %v965_v21  ;;  %v2551_v50 = vpop.permute.xlu1 %929  ;;  %v1595_v21 = vld [vmem:[%s2843_s6 + $0x48] sm:$0xff] }
 0x61d   :  { %v931_v38 = vsel %vm44_vm7, %v928_v14, %v2551_v50 }
 0x61e   :  { %v942_v7 = vmul.f32 %v931_v38, %v2155_v52  ;;  %v1034_v52 = vpop.permute.xlu0 %1033  ;;  %v1594_v38 = vld [vmem:[%s2843_s6 + $0x40] sm:$0xff] }
 0x61f   :  { %v1040_v53 = vsel %vm160_vm3, %v1034_v52, %v2474_v20  ;;  %v1606_v20 = vld [vmem:[%s2843_s6 + $0xa0] sm:$0xff] }
 0x620   :  { %1267 = vmatprep.subr.mxu1 %v942_v7  ;;  %v1106_v8 = vpop.permute.xlu1 %1105  ;;  %v1048_v14 = vmul.f32 %v1607_v62, %v1040_v53  ;;  %v1313_v62 = vld [vmem:[%s2849_s5 + $0x28] sm:$0xff]  ;;  %v1328_v53 = vld [vmem:[%s2849_s5 + $0xa0] sm:$0xff] }
 0x621   :  { %v1112_v4 = vsel %vm238_vm0, %v1106_v8, %v2468_v5  ;;  %v1113_v32 = vsel %vm238_vm0, %v2460_v23, %v1106_v8  ;;  %1268 = vmatpush1.msra.mxu1 %v941_v34  ;;  %v2608_v5 = vld [vmem:[%s2849_s5 + $0x70] sm:$0xff]  ;;  %v1610_v23 = vld [vmem:[%s2843_s6 + $0xc0] sm:$0xff] }
 0x622   :  { %v1119_v36 = vmul.f32 %v1618_v46, %v1113_v32  ;;  %v1120_v49 = vmul.f32 %v1619_v39, %v1112_v4  ;;  %1623 = vmatmul.mubr.msk.f32.vlgmr.msra.gmra.mxu1 %vm292_vm8, %v2567_v28  ;;  %1659 = vmatprep.subr.mxu1 %v2572_v10  ;;  %v972_v2 = vpop.permute.xlu0 %971  ;;  %v2736_v8 = vld [vmem:[%s2849_s5 + $0xc0] sm:$0xff]  ;;  %v1331_v32 = vld [vmem:[%s2849_s5 + $0xb8] sm:$0xff] }
 0x623   :  { %1660 = vmatpush3.msra.mxu1 %v2577_v58  ;;  %v981_v16 = vsel %vm95_vm5, %v972_v2, %v2499_v25  ;;  %v982_v7 = vsel %vm95_vm5, %v2529_v19, %v972_v2 }
 0x624   :  { %1180 = vmatprep.subr.mxu0 %v1120_v49  ;;  %v1058_v42 = vpop.permute.xlu1 %1057  ;;  %1661 = vmatprep.subr.mxu1 %v2600_v37  ;;  %v988_v18 = vmul.f32 %v1595_v21, %v981_v16  ;;  %v987_v27 = vmul.f32 %v1594_v38, %v982_v7  ;;  %v1315_v49 = vld [vmem:[%s2849_s5 + $0x38] sm:$0xff] }
 0x625   :  { %v1064_v43 = vsel %vm186_vm2, %v1058_v42, %v2494_v3  ;;  %v1065_v30 = vsel %vm186_vm2, %v2488_v9, %v1058_v42  ;;  %1181 = vmatpush1.msra.mxu0 %v1119_v36  ;;  %1662 = vmatpush3.msra.mxu1 %v2608_v5  ;;  %v1041_v3 = vsel %vm160_vm3, %v2466_v0, %v1034_v52  ;;  %v2656_v9 = vld [vmem:[%s2849_s5 + $0x60] sm:$0xff]  ;;  %v2665_v0 = vld [vmem:[%s2849_s5 + $0xd8] sm:$0xff]  ;;  %v1591_v52 = vld [vmem:[%s2843_s6 + $0x28] sm:$0xff] }
 0x626   :  { %v1071_v35 = vmul.f32 %v1610_v23, %v1065_v30  ;;  %v1072_v57 = vmul.f32 %v1611_v24, %v1064_v43  ;;  %1182 = vmatprep.subr.mxu0 %v1096_v48  ;;  %1663 = vmatprep.subr.mxu1 %v2620_v33  ;;  %v1047_v44 = vmul.f32 %v1606_v20, %v1041_v3  ;;  %v924_v46 = vpop.permute.xlu0 %923  ;;  %v1330_v23 = vld [vmem:[%s2849_s5 + $0xb0] sm:$0xff]  ;;  %v1329_v42 = vld [vmem:[%s2849_s5 + $0xa8] sm:$0xff]  ;;  %v1312_v43 = vld [vmem:[%s2849_s5 + $0x20] sm:$0xff] }
 0x627   :  { %1183 = vmatpush1.msra.mxu0 %v1095_v45  ;;  %1664 = vmatpush3.msra.mxu1 %v2626_v15  ;;  %v933_v4 = vsel %vm44_vm7, %v924_v46, %v2536_v41  ;;  %v1314_v24 = vld [vmem:[%s2849_s5 + $0x30] sm:$0xff]  ;;  %v1724_v45 = vld [vmem:[%s2843_s6] sm:$0xff]  ;;  %v1327_v30 = vld [vmem:[%s2849_s5 + $0x98] sm:$0xff] }
 0x628   :  { %1184 = vmatprep.subr.mxu0 %v1072_v57  ;;  %v996_v59 = vpop.permute.xlu1 %995  ;;  %1665 = vmatprep.subr.mxu1 %v2644_v61  ;;  %v1311_v20 = vld [vmem:[%s2849_s5 + $0x18] sm:$0xff]  ;;  %v1310_v3 = vld [vmem:[%s2849_s5 + $0x10] sm:$0xff] }
 0x629   :  { %v1005_v63 = vsel %vm121_vm4, %v996_v59, %v2520_v11  ;;  %1185 = vmatpush1.msra.mxu0 %v1071_v35  ;;  %1666 = vmatpush3.msra.mxu1 %v2656_v9  ;;  %v1006_v22 = vsel %vm121_vm4, %v2478_v1, %v996_v59  ;;  %v2699_v11 = vld [vmem:[%s2849_s5 + $0x50] sm:$0xff]  ;;  %v1023_v1 = vmul.f32 %v1602_v51, %v2370_v26  ;;  %v2724_v26 = vld [vmem:[%s2849_s5 + $0x48] sm:$0xff] }
 0x62a   :  { %1186 = vmatprep.subr.mxu0 %v1048_v14  ;;  %1667 = vmatprep.subr.mxu1 %v2665_v0  ;;  %v1012_v25 = vmul.f32 %v1599_v60, %v1005_v63  ;;  %v1011_v39 = vmul.f32 %v1598_v40, %v1006_v22  ;;  %v1725_v60 = vld [vmem:[%s2845_s4] sm:$0xff] }
 0x62b   :  { %1187 = vmatpush1.msra.mxu0 %v1047_v44  ;;  %1668 = vmatpush3.msra.mxu1 %v2674_v55  ;;  %v1741_v44 = vmov 5  }
 0x62c   :  { %1188 = vmatprep.subr.mxu0 %v1024_v17  ;;  %v948_v34 = vpop.permute.xlu1 %947  ;;  %1669 = vmatprep.subr.mxu1 %v2686_v54 }
 0x62d   :  { %v957_v19 = vsel %vm69_vm6, %v948_v34, %v2542_v56  ;;  %1189 = vmatpush1.msra.mxu0 %v1023_v1  ;;  %1670 = vmatpush3.msra.mxu1 %v2699_v11  ;;  %v958_v31 = vsel %vm69_vm6, %v2510_v29, %v948_v34  ;;  %v1316_v56 = vld [vmem:[%s2849_s5 + $0x40] sm:$0xff]  ;;  %v934_v29 = vsel %vm44_vm7, %v2551_v50, %v924_v46 }
 0x62e   :  { %1190 = vmatprep.subr.mxu0 %v1012_v25  ;;  %1671 = vmatprep.subr.mxu1 %v2712_v47  ;;  %v964_v36 = vmul.f32 %v1591_v52, %v957_v19  ;;  %v963_v41 = vmul.f32 %v1590_v13, %v958_v31  ;;  %v940_v50 = vmul.f32 %v1723_v6, %v933_v4 }
 0x62f   :  { %1191 = vmatpush1.msra.mxu0 %v1011_v39  ;;  %1672 = vmatpush3.msra.mxu1 %v2724_v26  ;;  %v939_v48 = vmul.f32 %v1724_v45, %v934_v29 }
 0x630   :  { %1192 = vmatprep.subr.mxu0 %v988_v18  ;;  %1673 = vmatprep.subr.mxu1 %v2736_v8 }
 0x631   :  { %1193 = vmatpush1.msra.mxu0 %v987_v27  ;;  %1674 = vmatpush3.msra.mxu1 %v1316_v56 }
 0x632   :  { %1194 = vmatprep.subr.mxu0 %v964_v36  ;;  %1675 = vmatprep.subr.mxu1 %v1331_v32 }
 0x633   :  { %1195 = vmatpush1.msra.mxu0 %v963_v41  ;;  %1676 = vmatpush3.msra.mxu1 %v1315_v49 }
 0x634   :  { %1196 = vmatprep.subr.mxu0 %v940_v50  ;;  %1677 = vmatprep.subr.mxu1 %v1330_v23 }
 0x635   :  { %1197 = vmatpush1.msra.mxu0 %v939_v48  ;;  %1678 = vmatpush3.msra.mxu1 %v1314_v24 }
 0x636   :  { %1622 = vmatmul.mubr.msk.f32.vlgmr.msra.gmra.mxu0 %vm292_vm8, %v2567_v28  ;;  %1679 = vmatprep.subr.mxu1 %v1329_v42  ;;  %v1326_v28 = vld [vmem:[%s2849_s5 + $0x90] sm:$0xff] }
 0x637   :  { %1680 = vmatpush3.msra.mxu1 %v1313_v62  ;;  %1624 = vmatprep.subr.mxu0 %v2572_v10  ;;  %v1325_v10 = vld [vmem:[%s2849_s5 + $0x88] sm:$0xff] }
 0x638   :  { %1681 = vmatprep.subr.mxu1 %v1328_v53  ;;  %1625 = vmatpush3.msra.mxu0 %v2577_v58  ;;  %v1309_v58 = vld [vmem:[%s2849_s5 + $0x8] sm:$0xff] }
 0x639   :  { %1682 = vmatpush3.msra.mxu1 %v1312_v43  ;;  %1626 = vmatprep.subr.mxu0 %v2600_v37  ;;  %v1324_v37 = vld [vmem:[%s2849_s5 + $0x80] sm:$0xff] }
 0x63a   :  { %1683 = vmatprep.subr.mxu1 %v1327_v30  ;;  %1627 = vmatpush3.msra.mxu0 %v2608_v5  ;;  %v1308_v5 = vld [vmem:[%s2849_s5] sm:$0xff] }
 0x63b   :  { %1684 = vmatpush3.msra.mxu1 %v1311_v20  ;;  %1628 = vmatprep.subr.mxu0 %v2620_v33 }
 0x63c   :  { %1685 = vmatprep.subr.mxu1 %v1326_v28  ;;  %1629 = vmatpush3.msra.mxu0 %v2626_v15 }
 0x63d   :  { %1686 = vmatpush3.msra.mxu1 %v1310_v3  ;;  %1630 = vmatprep.subr.mxu0 %v2644_v61 }
 0x63e   :  { %1631 = vmatpush3.msra.mxu0 %v2656_v9  ;;  %1687 = vmatprep.subr.mxu1 %v1325_v10 }
 0x63f   :  { %1632 = vmatprep.subr.mxu0 %v2665_v0  ;;  %1688 = vmatpush3.msra.mxu1 %v1309_v58 }
 0x640   :  { %1633 = vmatpush3.msra.mxu0 %v2674_v55  ;;  %1689 = vmatprep.subr.mxu1 %v1324_v37  ;;  %v1740_v55 = vmov 4  }
 0x641   :  { %1634 = vmatprep.subr.mxu0 %v2686_v54  ;;  %1690 = vmatpush3.msra.mxu1 %v1308_v5 }
 0x642   :  { %1635 = vmatpush3.msra.mxu0 %v2699_v11  ;;  %1714 = vset.pattern.permute.xlu0 %v1740_v55 }
 0x643   :  { %1636 = vmatprep.subr.mxu0 %v2712_v47  ;;  %1715 = vset.pattern.permute.xlu1 %v1741_v44 }
 0x644   :  { %1637 = vmatpush3.msra.mxu0 %v2724_v26 }
 0x645   :  { %1638 = vmatprep.subr.mxu0 %v2736_v8 }
 0x646   :  { %1639 = vmatpush3.msra.mxu0 %v1316_v56 }
 0x647   :  { %1640 = vmatprep.subr.mxu0 %v1331_v32 }
 0x648   :  { %1641 = vmatpush3.msra.mxu0 %v1315_v49 }
 0x649   :  { %1642 = vmatprep.subr.mxu0 %v1330_v23 }
 0x64a   :  { %1643 = vmatpush3.msra.mxu0 %v1314_v24 }
 0x64b   :  { %1644 = vmatprep.subr.mxu0 %v1329_v42 }
 0x64c   :  { %1645 = vmatpush3.msra.mxu0 %v1313_v62 }
 0x64d   :  { %1646 = vmatprep.subr.mxu0 %v1328_v53 }
 0x64e   :  { %1647 = vmatpush3.msra.mxu0 %v1312_v43 }
 0x64f   :  { %1648 = vmatprep.subr.mxu0 %v1327_v30 }
 0x650   :  { %1649 = vmatpush3.msra.mxu0 %v1311_v20 }
 0x651   :  { %1650 = vmatprep.subr.mxu0 %v1326_v28 }
 0x652   :  { %1651 = vmatpush3.msra.mxu0 %v1310_v3 }
 0x653   :  { %1652 = vmatprep.subr.mxu0 %v1325_v10 }
 0x654   :  { %1653 = vmatpush3.msra.mxu0 %v1309_v58 }
 0x655   :  { %1654 = vmatprep.subr.mxu0 %v1324_v37 }
 0x656   :  { %1655 = vmatpush3.msra.mxu0 %v1308_v5 }
 0x6e2   :  { %v1303_v33 = vpop.f32.mrf.mxu1 }
 0x6e4   :  { %v1305_v15 = vpop.f32.mrf.mxu1 }
 0x6e5   :  { %1476 = vmatprep.mubr.f32.mxu1 %v1305_v15 }
 0x6e6   :  { %1477 = vmatmul.mubr.f32.vlgmr.msra.gmra.mxu1 %v1303_v33 }
 0x6f6   :  { %v1232_v61 = vpop.f32.mrf.mxu0 }
 0x6f8   :  { %v1234_v2 = vpop.f32.mrf.mxu0 }
 0x6f9   :  { %1404 = vmatprep.mubr.f32.mxu0 %v1234_v2 }
 0x6fa   :  { %1405 = vmatmul.mubr.f32.vlgmr.msra.gmra.mxu0 %v1232_v61 }
 0x7a6   :  { %v1691_v35 = vpop.f32.mrf.mxu1 }
 0x7a8   :  { %v1692_v57 = vpop.f32.mrf.mxu1 }
 0x7a9   :  { %v1693_v9 = vadd.f32 %v1692_v57, %v1691_v35 }
 0x7ab   :  { %1483 = vrot.lane.b32.xlu1 %v1693_v9, %s1739_s22 }
 0x7ba   :  { %v1656_v12 = vpop.f32.mrf.mxu0 }
 0x7bc   :  { %v1657_v0 = vpop.f32.mrf.mxu0 }
 0x7bd   :  { %v1658_v14 = vadd.f32 %v1657_v0, %v1656_v12 }
 0x7bf   :  { %1411 = vst.msk [vmem:[%s2850_s8] sm:$0xff] %vm1410_vm9, %v1658_v14 }
 0x81d   :  { %v1484_v59 = vpop.permute.xlu1 %1483 }
 0x81e   :  { %1487 = vst.msk [vmem:[%s2850_s8] sm:$0xff] %vm1486_vm10, %v1484_v59 }
 0x825   :  { %v1488_v51 = vld [vmem:[%s2850_s8] sm:$0xff] }
 0x826   :  { %1489 = vadd.xlane.f32.xlu0 %v1488_v51 }
 0x83c   :  { %1501 = vperm.xlu0 %1714, %v1725_v60  }
 0x840   :  { %1716 = vset.pattern.permute.xlu0 %v1741_v44 }
 0x8af   :  { %v1490_v63 = vpop.xlane.xlu0 %1489 }
 0x8b0   :  { %v1491_v54 = vmul.f32 0.0078125, %v1490_v63 }
 0x8b2   :  { %v1492_v40 = vsub.f32 %v1488_v51, %v1491_v54 }
 0x8b4   :  { %v1493_v22 = vmul.f32 %v1492_v40, %v1492_v40 }
 0x8b6   :  { %1494 = vadd.xlane.f32.xlu1 %v1493_v22 }
 0x8b7   :  { %v1502_v1 = vpop.permute.xlu0 %1501 }
 0x8c7   :  { %1506 = vperm.xlu1 %1715, %v1725_v60  }
 0x93f   :  { %v1495_v17 = vpop.xlane.xlu1 %1494 }
 0x940   :  { %v1496_v11 = vmul.f32 0.0078125, %v1495_v17 }
 0x942   :  { %v1497_v21 = vadd.f32 1e-05, %v1496_v11 }
 0x943   :  { %v1507_v38 = vpop.permute.xlu1 %1506 }
 0x944   :  { %1721 = vrsqrt.f32 %v1497_v21 }
 0x951   :  { %v1722_v16 = vpop.eup %1721 }
 0x952   :  { %v1499_v47 = vmul.f32 %v1722_v16, %v1492_v40 }
 0x954   :  { %v1504_v7 = vmul.f32 %v1502_v1, %v1499_v47 }
 0x956   :  { %v1509_v46 = vadd.f32 %v1507_v38, %v1504_v7 }
 0x958   :  { %v1510_v25 = vmax.f32 %v1509_v46, 0.0 }
 0x95a   :  { %1511 = vst [vmem:[%s2850_s8] sm:$0xff] %v1510_v25 }

</bundles_post_ra>
